<compile_context>
chip_gen: v7x
topology: tpu7x:2x2x1
jax: 0.10.0
libtpu: 0.0.40
codegen_flags: <defaults>
</compile_context>

<pallas_src>
import functools

import jax
import jax.numpy as jnp
from jax.experimental import pallas as pl
from jax.experimental.pallas import tpu as pltpu


def _vmem_budget_bytes():
    """Generation-aware VMEM budget (~80% of physical VMEM)."""
    try:
        cap = int(pltpu.get_tpu_info().vmem_capacity_bytes)
    except Exception:          # pragma: no cover - query unavailable
        cap = 64 << 20         # conservative (v7x-sized) fallback
    return (cap * 4) // 5      # v7x: ~51 MiB of 64; v5e/v6e: ~102 MiB of 128


def _pick_tq(hw, budget_bytes, est_fn):
    """Largest query tile (128-multiple divisor of HW, or HW itself) fitting VMEM."""
    cands = [hw] + [t for t in (1024, 512, 256, 128) if t < hw and hw % t == 0]
    for t in cands:
        if est_fn(t) <= budget_bytes:
            return t
    # TODO(synk): key-axis streaming of v for very large HW; until then take the
    # smallest candidate and let vmem_limit_bytes cap the request.
    return cands[-1]


_NT_DIMS = (((1,), (1,)), ((), ()))   # contract both operands on their last axis


def _aggregate_kernel(heads, dim_head, has_project, *refs):
    # Refs (wp_ref / agg_scr only present when has_project):
    #   fmap_ref  : (C, HW)          full batch element (channels-first), for v
    #   fmapq_ref : (C, TQ)          residual slice for this query tile
    #   attn_ref  : (heads, TQ, HW)  one query tile of the attention (bf16)
    #   wv_ref    : (INNER, C)       to_v weight, transposed
    #   wp_ref    : (C, INNER)       project weight, transposed (bf16)
    #   gamma_ref : (1,) in SMEM
    #   out_ref   : (C, TQ)
    #   v_scr     : (INNER, HW)      persistent per-(batch, q-chunk) v^T scratch
    #   agg_scr   : (INNER, TQ)      per-tile head-concat aggregate scratch
    if has_project:
        (fmap_ref, fmapq_ref, attn_ref, wv_ref, wp_ref, gamma_ref,
         out_ref, v_scr, agg_scr) = refs
    else:
        (fmap_ref, fmapq_ref, attn_ref, wv_ref, gamma_ref,
         out_ref, v_scr) = refs
        wp_ref = agg_scr = None

    dh = dim_head
    qi = pl.program_id(2)

    # ---- v^T = Wv^T @ fmap, built once per (batch, outer-q chunk) ------------
    # One wide matmul (N = HW lanes) instead of a per-head loop; result kept in
    # the bf16 compute dtype so the attn @ v dots are single-pass MXU.
    @pl.when(qi == 0)
    def _():
        v_scr[...] = jnp.dot(
            wv_ref[...], fmap_ref[...],
            preferred_element_type=jnp.float32).astype(v_scr.dtype)

    gamma = gamma_ref[0]

    if has_project:
        # Per-head attn @ v in the transposed ("NT", flash-style) orientation;
        # each (DH, TQ) f32 result is consumed immediately (stored into the bf16
        # agg scratch) so vreg live ranges stay bounded for heads >= 4.
        for h in range(heads):
            out_h = jax.lax.dot_general(
                v_scr[h * dh:(h + 1) * dh, :], attn_ref[h],
                dimension_numbers=_NT_DIMS,
                preferred_element_type=jnp.float32)             # (DH, TQ)
            agg_scr[h * dh:(h + 1) * dh, :] = out_h.astype(agg_scr.dtype)
        # One full-depth (K = INNER) projection matmul -> (C, TQ), already in
        # the output orientation (lane-dense along HW): no result transpose.
        proj = jnp.dot(wp_ref[...], agg_scr[...],
                       preferred_element_type=jnp.float32)       # (C, TQ)
        out_ref[...] = (fmapq_ref[...].astype(jnp.float32)
                        + gamma * proj).astype(out_ref.dtype)
    else:
        # INNER == C: head h owns channel rows [h*DH, (h+1)*DH).
        for h in range(heads):
            out_h = jax.lax.dot_general(
                v_scr[h * dh:(h + 1) * dh, :], attn_ref[h],
                dimension_numbers=_NT_DIMS,
                preferred_element_type=jnp.float32)             # (DH, TQ)
            res = (fmapq_ref[h * dh:(h + 1) * dh, :].astype(jnp.float32)
                   + gamma * out_h)
            out_ref[h * dh:(h + 1) * dh, :] = res.astype(out_ref.dtype)


def aggregate_pallas(fmap_nchw, attn, wv, wp, gamma, *, heads, dim_head,
                     tq=None, compute_dtype=jnp.bfloat16):
    """Aggregate forward.

    fmap_nchw: (B, C, H, W)
    attn     : (B, heads, H*W, H*W)
    wv       : (C, heads*dim_head)         (== to_v.weight[:, :, 0, 0].T)
    wp       : (heads*dim_head, C) or None (== project.weight[:, :, 0, 0].T)
    gamma    : (1,)
    """
    B, C, H, W = fmap_nchw.shape
    HW = H * W
    INNER = heads * dim_head
    has_project = (C != INNER)
    assert attn.shape == (B, heads, HW, HW), attn.shape
    assert wv.shape == (C, INNER), wv.shape
    if has_project:
        assert wp is not None and wp.shape == (INNER, C)

    # Dominant HBM stream (attn) and the projection weight are fed in the bf16
    # compute dtype (accumulation stays f32 inside the kernel).  Under jit the
    # cast fuses into attn's producer; ideally the caller supplies bf16 attn.
    attn_c = attn if attn.dtype == compute_dtype else attn.astype(compute_dtype)
    # Tiny weight transposes only (no full-array activation transposes): the
    # kernel works entirely in the channels-first (C/INNER, HW) orientation.
    wv_t = jnp.transpose(wv)                                    # (INNER, C)
    wp_t = None
    if has_project:
        wp_t = jnp.transpose(wp).astype(compute_dtype)          # (C, INNER)

    fmap_isz = jnp.dtype(fmap_nchw.dtype).itemsize
    attn_isz = jnp.dtype(attn_c.dtype).itemsize
    wv_isz = jnp.dtype(wv_t.dtype).itemsize
    wp_isz = jnp.dtype(wp_t.dtype).itemsize if has_project else 0
    comp_isz = jnp.dtype(compute_dtype).itemsize
    out_isz = fmap_isz

    def est_bytes(tile):
        """Dtype-correct VMEM working set (double-buffered blocks + scratch)."""
        est = 2 * C * HW * fmap_isz               # full fmap block
        est += 2 * C * tile * fmap_isz            # residual fmap q-tile
        est += 2 * heads * tile * HW * attn_isz   # attn q-tile (dominant)
        est += 2 * INNER * C * wv_isz             # Wv^T (upper bound: 2 buffers)
        est += 2 * C * tile * out_isz             # out tile
        est += INNER * HW * comp_isz              # persistent v^T scratch
        if has_project:
            est += 2 * C * INNER * wp_isz         # Wp^T
            est += INNER * tile * comp_isz        # agg scratch
        return est

    budget = _vmem_budget_bytes()
    if tq is None:
        tq = _pick_tq(HW, budget, est_bytes)
    assert HW % tq == 0, (HW, tq)
    assert tq % 128 == 0 or tq == HW, tq          # lane-dense blocks
    num_q = HW // tq

    # (B, C, H, W) -> (B, C, HW): pure reshape, no HBM transpose (output comes
    # back as (B, C, HW) and is only reshaped).
    fmap3 = fmap_nchw.reshape(B, C, HW)

    # Outer/inner query split: a second "parallel" grid axis keeps both v7x
    # TensorCores busy at B == 1; v is rebuilt per (b, qo) chunk (cheap).
    nqo = 2 if (B == 1 and num_q % 2 == 0) else 1
    nqi = num_q // nqo
    grid = (B, nqo, nqi)

    est = est_bytes(tq)
    vmem_limit = int(min(budget, max(est + (est >> 2), 32 << 20)))

    flops = B * (nqo * 2 * HW * C * INNER                  # v build (per q chunk)
                 + 2 * HW * HW * INNER                     # attn @ v (all heads)
                 + (2 * HW * INNER * C if has_project else 0))
    bytes_accessed = (B * heads * HW * HW * attn_isz       # attn (dominant)
                      + 2 * B * C * HW * fmap_isz          # fmap (read twice)
                      + B * C * HW * out_isz               # output
                      + INNER * C * (wv_isz + wp_isz))

    kernel = functools.partial(_aggregate_kernel, heads, dim_head, has_project)

    inputs = [fmap3, fmap3, attn_c, wv_t]
    if has_project:
        inputs.append(wp_t)
    inputs.append(gamma)

    scratch = [pltpu.VMEM((INNER, HW), compute_dtype)]
    if has_project:
        scratch.append(pltpu.VMEM((INNER, tq), compute_dtype))

    def build(weight_mode):
        wkw = {} if weight_mode is None else {"pipeline_mode": weight_mode}
        in_specs = [
            # Full fmap (for the v build); re-DMA'd only when b changes.
            pl.BlockSpec((None, C, HW), lambda b, qo, qi: (b, 0, 0)),
            # Residual q-tile of fmap (no dynamic lane slicing in-kernel).
            pl.BlockSpec((None, C, tq),
                         lambda b, qo, qi: (b, 0, qo * nqi + qi)),
            # attn q-tile: per-step block is (heads, TQ, HW), not the full map.
            pl.BlockSpec((None, heads, tq, HW),
                         lambda b, qo, qi: (b, 0, qo * nqi + qi, 0)),
            # Grid-invariant weights: request single-buffering.
            pl.BlockSpec((INNER, C), lambda b, qo, qi: (0, 0), **wkw),
        ]
        if has_project:
            in_specs.append(
                pl.BlockSpec((C, INNER), lambda b, qo, qi: (0, 0), **wkw))
        in_specs.append(pl.BlockSpec(memory_space=pltpu.MemorySpace.SMEM))
        return pl.pallas_call(
            kernel,
            out_shape=jax.ShapeDtypeStruct((B, C, HW), fmap_nchw.dtype),
            grid=grid,
            in_specs=in_specs,
            out_specs=pl.BlockSpec((None, C, tq),
                                   lambda b, qo, qi: (b, 0, qo * nqi + qi)),
            scratch_shapes=scratch,
            compiler_params=pltpu.CompilerParams(
                # b / outer-q axes are megacore-shardable; the inner-q axis
                # carries the persistent v scratch (rebuilt at qi == 0).
                dimension_semantics=("parallel", "parallel", "arbitrary"),
                vmem_limit_bytes=vmem_limit),
            cost_estimate=pl.CostEstimate(flops=flops, transcendentals=0,
                                          bytes_accessed=bytes_accessed),
        )

    if hasattr(pl, "Buffered"):
        try:
            out3 = build(pl.Buffered(1))(*inputs)
        except Exception:
            # Fallback for jax versions without BlockSpec.pipeline_mode /
            # single-buffered pipelining (only costs extra weight VMEM).
            out3 = build(None)(*inputs)
    else:
        out3 = build(None)(*inputs)

    return out3.reshape(B, C, H, W)


def aggregate_reference(fmap_nchw, attn, wv, wp, gamma, *, heads, dim_head):
    """Pure-JAX (f32) reference mirroring the PyTorch forward."""
    B, C, H, W = fmap_nchw.shape
    HW = H * W
    INNER = heads * dim_head
    f = jnp.transpose(fmap_nchw.reshape(B, C, HW), (0, 2, 1))      # (B, HW, C)
    v = f @ wv                                                      # (B, HW, INNER)
    v = v.reshape(B, HW, heads, dim_head).transpose(0, 2, 1, 3)     # (B, h, HW, d)
    out = jnp.einsum('bhij,bhjd->bhid', attn, v)                    # (B, h, HW, d)
    out = out.transpose(0, 2, 1, 3).reshape(B, HW, INNER)           # (B, HW, INNER)
    if C != INNER:
        out = out @ wp                                              # (B, HW, C)
    res = f + gamma[0] * out
    return jnp.transpose(res, (0, 2, 1)).reshape(B, C, H, W)


if __name__ == "__main__":
    key = jax.random.PRNGKey(0)
    k1, k2, k3, k4, k5, k6, k7 = jax.random.split(key, 7)

    # --- Config 1: dim != inner_dim -> exercises the `project` path, multi-step
    #     query tiling (persistent v scratch) and the fused full-INNER projection.
    B, DIM, H, W = 2, 8, 16, 16
    HEADS, DIM_HEAD = 2, 128          # module default dim_head = 128
    INNER = HEADS * DIM_HEAD
    HW = H * W

    fmap = jax.random.normal(k1, (B, DIM, H, W), dtype=jnp.float32)
    attn = jax.nn.softmax(
        jax.random.normal(k2, (B, HEADS, HW, HW), dtype=jnp.float32), axis=-1)
    wv = jax.random.normal(k3, (DIM, INNER), dtype=jnp.float32) * 0.05
    wp = jax.random.normal(k4, (INNER, DIM), dtype=jnp.float32) * 0.05
    # PyTorch init is gamma = zeros(1); use a nonzero value so the aggregation
    # path actually contributes to the output.
    gamma = jnp.array([0.5], dtype=jnp.float32)

    out = aggregate_pallas(fmap, attn, wv, wp, gamma,
                           heads=HEADS, dim_head=DIM_HEAD, tq=128)
    out = jax.block_until_ready(out)
    ref = aggregate_reference(fmap, attn, wv, wp, gamma,
                              heads=HEADS, dim_head=DIM_HEAD)
    assert out.shape == (B, DIM, H, W)
    assert jnp.allclose(out, ref, atol=2e-2, rtol=2e-2), \
        f"config1 max abs err {jnp.max(jnp.abs(out - ref))}"

    # --- Config 2: dim == inner_dim (no projection), B == 1 -> exercises the
    #     no-project path and the parallel outer-query split (v7x dual core).
    B2, DIM2 = 1, INNER
    fmap2 = jax.random.normal(k5, (B2, DIM2, H, W), dtype=jnp.float32)
    attn2 = jax.nn.softmax(
        jax.random.normal(k6, (B2, HEADS, HW, HW), dtype=jnp.float32), axis=-1)
    wv2 = jax.random.normal(k7, (DIM2, INNER), dtype=jnp.float32) * 0.05

    out2 = aggregate_pallas(fmap2, attn2, wv2, None, gamma,
                            heads=HEADS, dim_head=DIM_HEAD, tq=128)
    out2 = jax.block_until_ready(out2)
    ref2 = aggregate_reference(fmap2, attn2, wv2, None, gamma,
                               heads=HEADS, dim_head=DIM_HEAD)
    assert out2.shape == (B2, DIM2, H, W)
    assert jnp.allclose(out2, ref2, atol=2e-2, rtol=2e-2), \
        f"config2 max abs err {jnp.max(jnp.abs(out2 - ref2))}"

    print("KERNEL_OK")
</pallas_src>

<mosaic_0001>
module attributes {stable_mosaic.version = 11 : i64} {
  func.func @_aggregate_kernel(%arg0: i32, %arg1: i32, %arg2: i32, %arg3: memref<1x8x256xf32, #tpu.memory_space<vmem>>, %arg4: memref<1x8x128xf32, #tpu.memory_space<vmem>>, %arg5: memref<1x2x128x256xbf16, #tpu.memory_space<vmem>>, %arg6: memref<256x8xf32, #tpu.memory_space<vmem>>, %arg7: memref<8x256xbf16, #tpu.memory_space<vmem>>, %arg8: memref<1xf32, #tpu.memory_space<smem>>, %arg9: memref<1x8x128xf32, #tpu.memory_space<vmem>>, %arg10: memref<256x256xbf16, #tpu.memory_space<vmem>>, %arg11: memref<256x128xbf16, #tpu.memory_space<vmem>>) attributes {dimension_semantics = [#tpu.dimension_semantics<parallel>, #tpu.dimension_semantics<parallel>, #tpu.dimension_semantics<arbitrary>], iteration_bounds = array<i64: 2, 1, 2>, scalar_prefetch = 0 : i64, scratch_operands = 2 : i64, tpu.core_type = #tpu.core_type<tc>, window_params = [{transform_indices = @transform_0, window_bounds = array<i64: 1, 8, 256>}, {transform_indices = @transform_1, window_bounds = array<i64: 1, 8, 128>}, {transform_indices = @transform_2, window_bounds = array<i64: 1, 2, 128, 256>}, {pipeline_mode = #tpu.pipeline_mode<synchronous>, transform_indices = @transform_3, window_bounds = array<i64: 256, 8>}, {pipeline_mode = #tpu.pipeline_mode<synchronous>, transform_indices = @transform_4, window_bounds = array<i64: 8, 256>}, {transform_indices = @transform_5, window_bounds = array<i64: 1>}, {transform_indices = @transform_6, window_bounds = array<i64: 1, 8, 128>}]} {
    %c0_i32 = arith.constant 0 : i32
    %0 = arith.cmpi eq, %arg2, %c0_i32 : i32
    %1 = arith.extui %0 : i1 to i32
    %c0_i32_0 = arith.constant 0 : i32
    %2 = arith.cmpi ne, %1, %c0_i32_0 : i32
    scf.if %2 {
      %c0_27 = arith.constant 0 : index
      %c0_28 = arith.constant 0 : index
      %27 = vector.load %arg6[%c0_27, %c0_28] : memref<256x8xf32, #tpu.memory_space<vmem>>, vector<256x8xf32>
      %c0_29 = arith.constant 0 : index
      %c0_30 = arith.constant 0 : index
      %c0_31 = arith.constant 0 : index
      %28 = vector.load %arg3[%c0_29, %c0_30, %c0_31] : memref<1x8x256xf32, #tpu.memory_space<vmem>>, vector<1x8x256xf32>
      %29 = vector.shape_cast %28 : vector<1x8x256xf32> to vector<8x256xf32>
      %cst_32 = arith.constant dense<0.000000e+00> : vector<256x256xf32>
      %30 = tpu.matmul %27, %29, %cst_32 {dimension_numbers = #tpu.dot_dimension_numbers<[1], [0], [0], [1], [0, 0, 1, 1], [], []>} : vector<256x8xf32>, vector<8x256xf32>, vector<256x256xf32> -> vector<256x256xf32>
      %31 = arith.truncf %30 : vector<256x256xf32> to vector<256x256xbf16>
      %c0_33 = arith.constant 0 : index
      %c0_34 = arith.constant 0 : index
      %32 = vector.load %arg10[%c0_33, %c0_34] : memref<256x256xbf16, #tpu.memory_space<vmem>>, vector<256x256xbf16>
      tpu.vector_store %arg10[%c0_33, %c0_34], %31 {strides = array<i32>} : memref<256x256xbf16, #tpu.memory_space<vmem>>, vector<256x256xbf16>,
    } else {
    }
    %c0 = arith.constant 0 : index
    %3 = memref.load %arg8[%c0] : memref<1xf32, #tpu.memory_space<smem>>
    %c0_1 = arith.constant 0 : index
    %c0_2 = arith.constant 0 : index
    %4 = vector.load %arg10[%c0_1, %c0_2] : memref<256x256xbf16, #tpu.memory_space<vmem>>, vector<128x256xbf16>
    %c0_3 = arith.constant 0 : index
    %c0_4 = arith.constant 0 : index
    %c0_5 = arith.constant 0 : index
    %c0_6 = arith.constant 0 : index
    %5 = vector.load %arg5[%c0_3, %c0_4, %c0_5, %c0_6] : memref<1x2x128x256xbf16, #tpu.memory_space<vmem>>, vector<1x1x128x256xbf16>
    %6 = vector.shape_cast %5 : vector<1x1x128x256xbf16> to vector<128x256xbf16>
    %cst = arith.constant dense<0.000000e+00> : vector<128x128xf32>
    %7 = tpu.matmul %4, %6, %cst {dimension_numbers = #tpu.dot_dimension_numbers<[1], [1], [0], [0], [0, 0, 1, 0], [], []>} : vector<128x256xbf16>, vector<128x256xbf16>, vector<128x128xf32> -> vector<128x128xf32>
    %8 = arith.truncf %7 : vector<128x128xf32> to vector<128x128xbf16>
    %c0_7 = arith.constant 0 : index
    %c0_8 = arith.constant 0 : index
    %9 = vector.load %arg11[%c0_7, %c0_8] : memref<256x128xbf16, #tpu.memory_space<vmem>>, vector<128x128xbf16>
    tpu.vector_store %arg11[%c0_7, %c0_8], %8 {strides = array<i32>} : memref<256x128xbf16, #tpu.memory_space<vmem>>, vector<128x128xbf16>,
    %c128 = arith.constant 128 : index
    %c0_9 = arith.constant 0 : index
    %10 = vector.load %arg10[%c128, %c0_9] : memref<256x256xbf16, #tpu.memory_space<vmem>>, vector<128x256xbf16>
    %c0_10 = arith.constant 0 : index
    %c1 = arith.constant 1 : index
    %c0_11 = arith.constant 0 : index
    %c0_12 = arith.constant 0 : index
    %11 = vector.load %arg5[%c0_10, %c1, %c0_11, %c0_12] : memref<1x2x128x256xbf16, #tpu.memory_space<vmem>>, vector<1x1x128x256xbf16>
    %12 = vector.shape_cast %11 : vector<1x1x128x256xbf16> to vector<128x256xbf16>
    %cst_13 = arith.constant dense<0.000000e+00> : vector<128x128xf32>
    %13 = tpu.matmul %10, %12, %cst_13 {dimension_numbers = #tpu.dot_dimension_numbers<[1], [1], [0], [0], [0, 0, 1, 0], [], []>} : vector<128x256xbf16>, vector<128x256xbf16>, vector<128x128xf32> -> vector<128x128xf32>
    %14 = arith.truncf %13 : vector<128x128xf32> to vector<128x128xbf16>
    %c128_14 = arith.constant 128 : index
    %c0_15 = arith.constant 0 : index
    %15 = vector.load %arg11[%c128_14, %c0_15] : memref<256x128xbf16, #tpu.memory_space<vmem>>, vector<128x128xbf16>
    tpu.vector_store %arg11[%c128_14, %c0_15], %14 {strides = array<i32>} : memref<256x128xbf16, #tpu.memory_space<vmem>>, vector<128x128xbf16>,
    %c0_16 = arith.constant 0 : index
    %c0_17 = arith.constant 0 : index
    %16 = vector.load %arg7[%c0_16, %c0_17] : memref<8x256xbf16, #tpu.memory_space<vmem>>, vector<8x256xbf16>
    %c0_18 = arith.constant 0 : index
    %c0_19 = arith.constant 0 : index
    %17 = vector.load %arg11[%c0_18, %c0_19] : memref<256x128xbf16, #tpu.memory_space<vmem>>, vector<256x128xbf16>
    %cst_20 = arith.constant dense<0.000000e+00> : vector<8x128xf32>
    %18 = tpu.matmul %16, %17, %cst_20 {dimension_numbers = #tpu.dot_dimension_numbers<[1], [0], [0], [1], [0, 0, 1, 1], [], []>} : vector<8x256xbf16>, vector<256x128xbf16>, vector<8x128xf32> -> vector<8x128xf32>
    %c0_21 = arith.constant 0 : index
    %c0_22 = arith.constant 0 : index
    %c0_23 = arith.constant 0 : index
    %19 = vector.load %arg4[%c0_21, %c0_22, %c0_23] : memref<1x8x128xf32, #tpu.memory_space<vmem>>, vector<1x8x128xf32>
    %20 = vector.shape_cast %19 : vector<1x8x128xf32> to vector<8x128xf32>
    %21 = vector.broadcast %3 : f32 to vector<8x128xf32>
    %22 = arith.mulf %21, %18 : vector<8x128xf32>
    %23 = arith.addf %20, %22 : vector<8x128xf32>
    %c0_24 = arith.constant 0 : index
    %c0_25 = arith.constant 0 : index
    %c0_26 = arith.constant 0 : index
    %24 = vector.load %arg9[%c0_24, %c0_25, %c0_26] : memref<1x8x128xf32, #tpu.memory_space<vmem>>, vector<1x8x128xf32>
    %25 = vector.shape_cast %24 : vector<1x8x128xf32> to vector<8x128xf32>
    %26 = vector.shape_cast %23 : vector<8x128xf32> to vector<1x8x128xf32>
    tpu.vector_store %arg9[%c0_24, %c0_25, %c0_26], %26 {strides = array<i32>} : memref<1x8x128xf32, #tpu.memory_space<vmem>>, vector<1x8x128xf32>,
    return
  }
  func.func @transform_0(%arg0: i32, %arg1: i32, %arg2: i32) -> (i32, i32, i32) {
    %c0_i32 = arith.constant 0 : i32
    %c0_i32_0 = arith.constant 0 : i32
    %c0_i32_1 = arith.constant 0 : i32
    return %arg0, %c0_i32, %c0_i32_0 : i32, i32, i32
  }
  func.func @transform_1(%arg0: i32, %arg1: i32, %arg2: i32) -> (i32, i32, i32) {
    %c2_i32 = arith.constant 2 : i32
    %0 = arith.muli %arg1, %c2_i32 : i32
    %1 = arith.addi %0, %arg2 : i32
    %c0_i32 = arith.constant 0 : i32
    %c0_i32_0 = arith.constant 0 : i32
    return %arg0, %c0_i32, %1 : i32, i32, i32
  }
  func.func @transform_2(%arg0: i32, %arg1: i32, %arg2: i32) -> (i32, i32, i32, i32) {
    %c2_i32 = arith.constant 2 : i32
    %0 = arith.muli %arg1, %c2_i32 : i32
    %1 = arith.addi %0, %arg2 : i32
    %c0_i32 = arith.constant 0 : i32
    %c0_i32_0 = arith.constant 0 : i32
    %c0_i32_1 = arith.constant 0 : i32
    return %arg0, %c0_i32, %1, %c0_i32_0 : i32, i32, i32, i32
  }
  func.func @transform_3(%arg0: i32, %arg1: i32, %arg2: i32) -> (i32, i32) {
    %c0_i32 = arith.constant 0 : i32
    %c0_i32_0 = arith.constant 0 : i32
    %c0_i32_1 = arith.constant 0 : i32
    return %c0_i32, %c0_i32_0 : i32, i32
  }
  func.func @transform_4(%arg0: i32, %arg1: i32, %arg2: i32) -> (i32, i32) {
    %c0_i32 = arith.constant 0 : i32
    %c0_i32_0 = arith.constant 0 : i32
    %c0_i32_1 = arith.constant 0 : i32
    return %c0_i32, %c0_i32_0 : i32, i32
  }
  func.func @transform_5(%arg0: i32, %arg1: i32, %arg2: i32) -> i32 {
    %c0_i32 = arith.constant 0 : i32
    %c0_i32_0 = arith.constant 0 : i32
    return %c0_i32 : i32
  }
  func.func @transform_6(%arg0: i32, %arg1: i32, %arg2: i32) -> (i32, i32, i32) {
    %c2_i32 = arith.constant 2 : i32
    %0 = arith.muli %arg1, %c2_i32 : i32
    %1 = arith.addi %0, %arg2 : i32
    %c0_i32 = arith.constant 0 : i32
    %c0_i32_0 = arith.constant 0 : i32
    return %arg0, %c0_i32, %1 : i32, i32, i32
  }
}

module attributes {stable_mosaic.version = 11 : i64} {
  func.func @_aggregate_kernel(%arg0: i32, %arg1: i32, %arg2: i32, %arg3: memref<1x8x256xf32, #tpu.memory_space<vmem>>, %arg4: memref<1x8x128xf32, #tpu.memory_space<vmem>>, %arg5: memref<1x2x128x256xbf16, #tpu.memory_space<vmem>>, %arg6: memref<256x8xf32, #tpu.memory_space<vmem>>, %arg7: memref<8x256xbf16, #tpu.memory_space<vmem>>, %arg8: memref<1xf32, #tpu.memory_space<smem>>, %arg9: memref<1x8x128xf32, #tpu.memory_space<vmem>>, %arg10: memref<256x256xbf16, #tpu.memory_space<vmem>>, %arg11: memref<256x128xbf16, #tpu.memory_space<vmem>>) attributes {dimension_semantics = [#tpu.dimension_semantics<parallel>, #tpu.dimension_semantics<parallel>, #tpu.dimension_semantics<arbitrary>], iteration_bounds = array<i64: 2, 1, 2>, scalar_prefetch = 0 : i64, scratch_operands = 2 : i64, tpu.core_type = #tpu.core_type<tc>, window_params = [{transform_indices = @transform_0, window_bounds = array<i64: 1, 8, 256>}, {transform_indices = @transform_1, window_bounds = array<i64: 1, 8, 128>}, {transform_indices = @transform_2, window_bounds = array<i64: 1, 2, 128, 256>}, {pipeline_mode = #tpu.pipeline_mode<synchronous>, transform_indices = @transform_3, window_bounds = array<i64: 256, 8>}, {pipeline_mode = #tpu.pipeline_mode<synchronous>, transform_indices = @transform_4, window_bounds = array<i64: 8, 256>}, {transform_indices = @transform_5, window_bounds = array<i64: 1>}, {transform_indices = @transform_6, window_bounds = array<i64: 1, 8, 128>}]} {
    %c0_i32 = arith.constant 0 : i32
    %0 = arith.cmpi eq, %arg2, %c0_i32 : i32
    %1 = arith.extui %0 : i1 to i32
    %c0_i32_0 = arith.constant 0 : i32
    %2 = arith.cmpi ne, %1, %c0_i32_0 : i32
    scf.if %2 {
      %c0_27 = arith.constant 0 : index
      %c0_28 = arith.constant 0 : index
      %27 = vector.load %arg6[%c0_27, %c0_28] : memref<256x8xf32, #tpu.memory_space<vmem>>, vector<256x8xf32>
      %c0_29 = arith.constant 0 : index
      %c0_30 = arith.constant 0 : index
      %c0_31 = arith.constant 0 : index
      %28 = vector.load %arg3[%c0_29, %c0_30, %c0_31] : memref<1x8x256xf32, #tpu.memory_space<vmem>>, vector<1x8x256xf32>
      %29 = vector.shape_cast %28 : vector<1x8x256xf32> to vector<8x256xf32>
      %cst_32 = arith.constant dense<0.000000e+00> : vector<256x256xf32>
      %30 = tpu.matmul %27, %29, %cst_32 {dimension_numbers = #tpu.dot_dimension_numbers<[1], [0], [0], [1], [0, 0, 1, 1], [], []>} : vector<256x8xf32>, vector<8x256xf32>, vector<256x256xf32> -> vector<256x256xf32>
      %31 = arith.truncf %30 : vector<256x256xf32> to vector<256x256xbf16>
      %c0_33 = arith.constant 0 : index
      %c0_34 = arith.constant 0 : index
      %32 = vector.load %arg10[%c0_33, %c0_34] : memref<256x256xbf16, #tpu.memory_space<vmem>>, vector<256x256xbf16>
      tpu.vector_store %arg10[%c0_33, %c0_34], %31 {strides = array<i32>} : memref<256x256xbf16, #tpu.memory_space<vmem>>, vector<256x256xbf16>,
    } else {
    }
    %c0 = arith.constant 0 : index
    %3 = memref.load %arg8[%c0] : memref<1xf32, #tpu.memory_space<smem>>
    %c0_1 = arith.constant 0 : index
    %c0_2 = arith.constant 0 : index
    %4 = vector.load %arg10[%c0_1, %c0_2] : memref<256x256xbf16, #tpu.memory_space<vmem>>, vector<128x256xbf16>
    %c0_3 = arith.constant 0 : index
    %c0_4 = arith.constant 0 : index
    %c0_5 = arith.constant 0 : index
    %c0_6 = arith.constant 0 : index
    %5 = vector.load %arg5[%c0_3, %c0_4, %c0_5, %c0_6] : memref<1x2x128x256xbf16, #tpu.memory_space<vmem>>, vector<1x1x128x256xbf16>
    %6 = vector.shape_cast %5 : vector<1x1x128x256xbf16> to vector<128x256xbf16>
    %cst = arith.constant dense<0.000000e+00> : vector<128x128xf32>
    %7 = tpu.matmul %4, %6, %cst {dimension_numbers = #tpu.dot_dimension_numbers<[1], [1], [0], [0], [0, 0, 1, 0], [], []>} : vector<128x256xbf16>, vector<128x256xbf16>, vector<128x128xf32> -> vector<128x128xf32>
    %8 = arith.truncf %7 : vector<128x128xf32> to vector<128x128xbf16>
    %c0_7 = arith.constant 0 : index
    %c0_8 = arith.constant 0 : index
    %9 = vector.load %arg11[%c0_7, %c0_8] : memref<256x128xbf16, #tpu.memory_space<vmem>>, vector<128x128xbf16>
    tpu.vector_store %arg11[%c0_7, %c0_8], %8 {strides = array<i32>} : memref<256x128xbf16, #tpu.memory_space<vmem>>, vector<128x128xbf16>,
    %c128 = arith.constant 128 : index
    %c0_9 = arith.constant 0 : index
    %10 = vector.load %arg10[%c128, %c0_9] : memref<256x256xbf16, #tpu.memory_space<vmem>>, vector<128x256xbf16>
    %c0_10 = arith.constant 0 : index
    %c1 = arith.constant 1 : index
    %c0_11 = arith.constant 0 : index
    %c0_12 = arith.constant 0 : index
    %11 = vector.load %arg5[%c0_10, %c1, %c0_11, %c0_12] : memref<1x2x128x256xbf16, #tpu.memory_space<vmem>>, vector<1x1x128x256xbf16>
    %12 = vector.shape_cast %11 : vector<1x1x128x256xbf16> to vector<128x256xbf16>
    %cst_13 = arith.constant dense<0.000000e+00> : vector<128x128xf32>
    %13 = tpu.matmul %10, %12, %cst_13 {dimension_numbers = #tpu.dot_dimension_numbers<[1], [1], [0], [0], [0, 0, 1, 0], [], []>} : vector<128x256xbf16>, vector<128x256xbf16>, vector<128x128xf32> -> vector<128x128xf32>
    %14 = arith.truncf %13 : vector<128x128xf32> to vector<128x128xbf16>
    %c128_14 = arith.constant 128 : index
    %c0_15 = arith.constant 0 : index
    %15 = vector.load %arg11[%c128_14, %c0_15] : memref<256x128xbf16, #tpu.memory_space<vmem>>, vector<128x128xbf16>
    tpu.vector_store %arg11[%c128_14, %c0_15], %14 {strides = array<i32>} : memref<256x128xbf16, #tpu.memory_space<vmem>>, vector<128x128xbf16>,
    %c0_16 = arith.constant 0 : index
    %c0_17 = arith.constant 0 : index
    %16 = vector.load %arg7[%c0_16, %c0_17] : memref<8x256xbf16, #tpu.memory_space<vmem>>, vector<8x256xbf16>
    %c0_18 = arith.constant 0 : index
    %c0_19 = arith.constant 0 : index
    %17 = vector.load %arg11[%c0_18, %c0_19] : memref<256x128xbf16, #tpu.memory_space<vmem>>, vector<256x128xbf16>
    %cst_20 = arith.constant dense<0.000000e+00> : vector<8x128xf32>
    %18 = tpu.matmul %16, %17, %cst_20 {dimension_numbers = #tpu.dot_dimension_numbers<[1], [0], [0], [1], [0, 0, 1, 1], [], []>} : vector<8x256xbf16>, vector<256x128xbf16>, vector<8x128xf32> -> vector<8x128xf32>
    %c0_21 = arith.constant 0 : index
    %c0_22 = arith.constant 0 : index
    %c0_23 = arith.constant 0 : index
    %19 = vector.load %arg4[%c0_21, %c0_22, %c0_23] : memref<1x8x128xf32, #tpu.memory_space<vmem>>, vector<1x8x128xf32>
    %20 = vector.shape_cast %19 : vector<1x8x128xf32> to vector<8x128xf32>
    %21 = vector.broadcast %3 : f32 to vector<8x128xf32>
    %22 = arith.mulf %21, %18 : vector<8x128xf32>
    %23 = arith.addf %20, %22 : vector<8x128xf32>
    %c0_24 = arith.constant 0 : index
    %c0_25 = arith.constant 0 : index
    %c0_26 = arith.constant 0 : index
    %24 = vector.load %arg9[%c0_24, %c0_25, %c0_26] : memref<1x8x128xf32, #tpu.memory_space<vmem>>, vector<1x8x128xf32>
    %25 = vector.shape_cast %24 : vector<1x8x128xf32> to vector<8x128xf32>
    %26 = vector.shape_cast %23 : vector<8x128xf32> to vector<1x8x128xf32>
    tpu.vector_store %arg9[%c0_24, %c0_25, %c0_26], %26 {strides = array<i32>} : memref<1x8x128xf32, #tpu.memory_space<vmem>>, vector<1x8x128xf32>,
    return
  }
  func.func @transform_0(%arg0: i32, %arg1: i32, %arg2: i32) -> (i32, i32, i32) {
    %c0_i32 = arith.constant 0 : i32
    %c0_i32_0 = arith.constant 0 : i32
    %c0_i32_1 = arith.constant 0 : i32
    return %arg0, %c0_i32, %c0_i32_0 : i32, i32, i32
  }
  func.func @transform_1(%arg0: i32, %arg1: i32, %arg2: i32) -> (i32, i32, i32) {
    %c2_i32 = arith.constant 2 : i32
    %0 = arith.muli %arg1, %c2_i32 : i32
    %1 = arith.addi %0, %arg2 : i32
    %c0_i32 = arith.constant 0 : i32
    %c0_i32_0 = arith.constant 0 : i32
    return %arg0, %c0_i32, %1 : i32, i32, i32
  }
  func.func @transform_2(%arg0: i32, %arg1: i32, %arg2: i32) -> (i32, i32, i32, i32) {
    %c2_i32 = arith.constant 2 : i32
    %0 = arith.muli %arg1, %c2_i32 : i32
    %1 = arith.addi %0, %arg2 : i32
    %c0_i32 = arith.constant 0 : i32
    %c0_i32_0 = arith.constant 0 : i32
    %c0_i32_1 = arith.constant 0 : i32
    return %arg0, %c0_i32, %1, %c0_i32_0 : i32, i32, i32, i32
  }
  func.func @transform_3(%arg0: i32, %arg1: i32, %arg2: i32) -> (i32, i32) {
    %c0_i32 = arith.constant 0 : i32
    %c0_i32_0 = arith.constant 0 : i32
    %c0_i32_1 = arith.constant 0 : i32
    return %c0_i32, %c0_i32_0 : i32, i32
  }
  func.func @transform_4(%arg0: i32, %arg1: i32, %arg2: i32) -> (i32, i32) {
    %c0_i32 = arith.constant 0 : i32
    %c0_i32_0 = arith.constant 0 : i32
    %c0_i32_1 = arith.constant 0 : i32
    return %c0_i32, %c0_i32_0 : i32, i32
  }
  func.func @transform_5(%arg0: i32, %arg1: i32, %arg2: i32) -> i32 {
    %c0_i32 = arith.constant 0 : i32
    %c0_i32_0 = arith.constant 0 : i32
    return %c0_i32 : i32
  }
  func.func @transform_6(%arg0: i32, %arg1: i32, %arg2: i32) -> (i32, i32, i32) {
    %c2_i32 = arith.constant 2 : i32
    %0 = arith.muli %arg1, %c2_i32 : i32
    %1 = arith.addi %0, %arg2 : i32
    %c0_i32 = arith.constant 0 : i32
    %c0_i32_0 = arith.constant 0 : i32
    return %arg0, %c0_i32, %1 : i32, i32, i32
  }
}

</mosaic_0001>

<bundles_post_ra>
// kernel: tpu_custom_call.1
= control target key start
LH: loop header
LB: loop body
LE: loop exit
PB: predicated region body
PF: predicated region fallthrough
CT: control target
= control target key end

     0   :  { %s2329_s0 = inlined_call_operand.vmem [shape: f32[2,8,256], index: 0, kind: input, shape index: {}]   ;;  %s2330_s1 = inlined_call_operand.vmem [shape: f32[2,8,256], index: 1, kind: input, shape index: {}]   ;;  %s2331_s2 = inlined_call_operand.hbm [shape: bf16[2,2,256,256], index: 2, kind: input, shape index: {}]   ;;  %s2332_s3 = inlined_call_operand.vmem [shape: f32[256,8], index: 3, kind: input, shape index: {}]   ;;  %s2333_s4 = inlined_call_operand.vmem [shape: bf16[8,256], index: 4, kind: input, shape index: {}]   ;;  %s2334_s5 = inlined_call_operand.<no memory space> [shape: f32[1], index: 5, kind: input, shape index: {}]   ;;  %s2335_s6 = inlined_call_operand.hbm [shape: f32[2,8,256], index: 6, kind: output, shape index: {}]  }
   0x1   :  { %2340 = sst [smem:[#allocation18_spill]] %s2331_s2 }
   0x2   :  { %11 = sst [smem:[#allocation4]] %s2334_s5 }
   0x3   :  { %12 = vsyncpa [#allocation6], 0 }
   0x4   :  { %14 = vsyncpa [#allocation6 + $0x1], 0 }
   0x5   :  { %15 = vsyncpa [#allocation7], 0 }
   0x6   :  { %17 = vsyncpa [#allocation7 + $0x1], 0  ;;  %s1936_s23 = smov 0   ;;  %s1938_s24 = smov 0  }
   0x7   :  { %s1940_s25 = smov 0   ;;  %s1942_s26 = smov 0  }
   0x8   :  { %s1944_s27 = smov 0   ;;  %s1946_s28 = smov 0  }
   0x9   :  { %s1948_s29 = smov 0   ;;  %s1950_s30 = smov 0  }
   0xa LB: > { %2341 = sst [smem:[#allocation14_spill]] %s1880_s28  ;;  %s1521_s5 = sadd.s32 4294967295, %s1888_s30   ;;  %s1888_s30 = sphi %s1950_s30, %s23_s30   ;;  %s1884_s29 = sphi %s1948_s29, %s2353_s29   ;;  %s1880_s28 = sphi %s1946_s28, %s2352_s28   ;;  %s1876_s27 = sphi %s1944_s27, %s2351_s27   ;;  %s1872_s26 = sphi %s1942_s26, %s2350_s26   ;;  %s1868_s25 = sphi %s1940_s25, %s2356_s25   ;;  %s1864_s24 = sphi %s1938_s24, %s2355_s24   ;;  %s1860_s23 = sphi %s1936_s23, %s2354_s23  }
   0xb   : > { %2342 = sst [smem:[#allocation15_spill]] %s1884_s29  ;;  %s1522_s7 = sadd.s32 4294967294, %s1888_s30  }
   0xc   : > { %s35_s8 = sadd.s32 1, %s1880_s28  ;;  %s42_s9 = sadd.s32 1, %s1884_s29 }
   0xd   : > { %p36_p0 = scmp.ge.s32.totalorder %s35_s8, 2  ;;  %p120_p1 = scmp.ne.s32.totalorder %s1868_s25, %s1864_s24 }
   0xe   : > { %p121_p2 = scmp.eq.s32.totalorder %s1888_s30, 0  ;;  %p126_p5 = scmp.ne.s32.totalorder %s1864_s24, %s1860_s23 }
   0xf   : > { %s2358_s8 = smov (%p36_p0, %s35_s8), 0  ;;  %s2360_s9 = smov (!%p36_p0, %s42_s9), %s1884_s29 }
  0x10   : > { %2343 = sst [smem:[#allocation16_spill]] %s2358_s8  ;;  %s109_s10 = ssub.s32 %s1880_s28, %s2358_s8 }
  0x11   : > { %p1988_p3 = por %p121_p2, %p120_p1  ;;  %p44_p4 = scmp.ge.s32.totalorder %s2360_s9, 2 }
  0x12   : > { %p127_p6 = scmp.eq.s32.totalorder %s1521_s5, 0  ;;  %p219_p7 = scmp.eq.s32.totalorder %s1521_s5, 3 }
  0x13   : > { %s2362_s9 = smov (%p44_p4, %s2360_s9), 0  ;;  %p225_p10 = scmp.eq.s32.totalorder %s1522_s7, 3 }
  0x14   : > { %2345 = sst [smem:[#allocation17_spill]] %s2362_s9  ;;  %p1996_p8 = por %p127_p6, %p126_p5 }
  0x15   : > { %p2000_p9 = por %p219_p7, %p120_p1  ;;  %s108_s14 = ssub.s32 %s1884_s29, %s2362_s9 }
  0x16   : > { %s110_s15 = sor.u32 %s109_s10, %s108_s14  ;;  %s113_s16 = sadd.s32 1, %s1868_s25 }
  0x17   : > { %p111_p11 = scmp.eq.s32.totalorder %s110_s15, 0  ;;  %p2007_p12 = por %p225_p10, %p126_p5 }
  0x18   : > { %p1524_p13 = scmp.ge.s32.totalorder %s1888_s30, 4 }
  0x19   : > { %s2012_s18 = scalar_select %p111_p11, %s1868_s25, %s113_s16  }
  0x1a   : > { %250 = sbr.rel (%p1524_p13) target bundleno = 49 (0x31), region = 28 }
  0x21   : > { %s277_s19 = sand.u32 1, %s1868_s25   ;;  %s1627_s20 = sshll.u32 %s1880_s28, 5 }
  0x22   : > { %s1525_s21 = sshll.u32 %s277_s19, 8  ;;  %s1528_s22 = sshll.u32 %s1884_s29, 7 }
  0x23   : > { %s290_s5 = sadd.s32 %s1627_s20, %s1528_s22  ;;  %s281_s7 = scalar_lea.vmem [#allocation5], %s1525_s21 }
  0x24   : > { %s305_s10 = sshll.u32 %s281_s7, 4  ;;  %s1529_s14 = sshll.u32 %s290_s5, 6  ;;  %s306_s10 = int_to_ptr.vmem [resolvable:$true] %s305_s10 }
  0x25   : > { %s1653_s15 = scalar_select %p1988_p3, [#allocation0], [#allocation11] }
  0x26   : > { %s1890_s16 = smov 4096   ;;  %s1891_s8 = smov 2048  }
  0x27   : > { %1654 = sst [smem:[#allocation10]] (%p1988_p3), %s1890_s16  ;;  %s1892_s28 = smov 16  }
  0x28   : > { %s297_s9 = sld [smem:[%s1653_s15]]   ;;  %s1893_s20 = smov 128  }
  0x29   : > { %1655 = sst [smem:[#allocation10 + $0x1]] (%p1988_p3), %s1891_s8  ;;  %s2349_s2 = sld [smem:[#allocation18_spill]] }
  0x2a   : > { %1656 = sst [smem:[#allocation10 + $0x2]] (%p1988_p3), %s1892_s28  ;;  %s1894_s7 = smov 8  }
  0x2b   : > { %1657 = sst [smem:[#allocation10 + $0x3]] (%p1988_p3), %s1893_s20  ;;  %s278_s29 = scalar_lea.sflag [#allocation6], %s277_s19 }
  0x2c   : > { %1658 = sst [smem:[#allocation10 + $0x4]] (%p1988_p3), %s1893_s20  ;;  %s1895_s8 = smov [#allocation9]  }
  0x2d   : > { %1659 = sst [smem:[#allocation10 + $0x5]] (%p1988_p3), %s1894_s7 }
  0x2e   : > { %s1530_s15 = sshll.u32 %s297_s9, 26 }
  0x2f   : > { %s292_s5 = scalar_lea.hbm %s2349_s2, %s1529_s14  ;;  %s1531_s16 = sadd.s32 134217728, %s1530_s15 }
  0x30   : > { %1660 = dma.general (%p1988_p3), %s292_s5, 4096, %s306_s10, %s278_s29, %s1895_s8, [#allocation10], %s1531_s16, 0  }
  0x31 PF: > { %p1532_p0 = scmp.ge.s32.totalorder %s1888_s30, 1  ;;  %p326_p1 = scmp.lt.s32.totalorder %s1888_s30, 5 }
  0x33   : > { %p327_p2 = pnand %p1532_p0, %p326_p1 }
  0x34   : > { %s2040_s28 = sand.u32 (!%p327_p2), 1, %s1864_s24  }
  0x35   : > { %330 = sbr.rel (%p327_p2) target bundleno = 923 (0x39b), region = 44  ;;  %s1533_s14 = sshll.u32 (!%p327_p2), %s2040_s28, 8 }
  0x36   : > { %s333_s9 = scalar_lea.sflag (!%p327_p2), [#allocation6], %s2040_s28  ;;  %s2044_s20 = scalar_lea.vmem (!%p327_p2), [#allocation5], %s1533_s14 }
  0x3c   : > { %1851 = dma.done.wait (%p1996_p8), %s333_s9, 4096  }
  0x3d   : > { %1853 = vsyncadd (%p1996_p8), %s333_s9, 4294963200  ;;  %s1534_s29 = sshll.u32 %s2040_s28, 3  ;;  %p380_p3 = scmp.lt.s32.totalorder %s1876_s27, 1 }
  0x3e   : > { %p389_p4 = scmp.lt.s32.totalorder %s1872_s26, 1  ;;  %s2063_s9 = scalar_lea.vmem [#allocation8], %s1534_s29 }
  0x3f   : > { %s381_s11 = scalar_select %p380_p3, %s1876_s27, 1 }
  0x40   : > { %s390_s19 = scalar_select %p389_p4, %s1872_s26, 1 }
  0x41   : > { %s1628_s10 = sshll.u32 %s381_s11, 4  ;;  %s1537_s21 = sshll.u32 %s381_s11, 1 }
  0x42   : > { %s384_s7 = scalar_lea.vmem %s2329_s0, %s1628_s10  ;;  %s392_s15 = sadd.s32 %s1537_s21, %s390_s19 }
  0x43   : > { %s1538_s16 = sshll.u32 %s392_s15, 3  ;;  %p1539_p5 = scmp.ne.s32.totalorder %s1872_s26, 0 }
  0x44   : > { %s2061_s14 = scalar_lea.vmem %s2330_s1, %s1538_s16  ;;  %v440_v0 = vld [vmem:[%s384_s7 + $0x8] sm:$0xff] (!%p1539_p5)  ;;  %v439_v1 = vld [vmem:[%s384_s7] sm:$0xff] (!%p1539_p5)  ;;  %vm441_vm0 = vcmask (!%p1539_p5), 64512   ;;  %v1896_v4 = vmov (!%p1539_p5), 0.0   ;;  %v409_v7 = vld [vmem:[%s2332_s3 + $0x10] sm:$0xff] (!%p1539_p5) }
  0x45   : > { %406 = sbr.rel (%p1539_p5) target bundleno = 348 (0x15c), region = 52  ;;  %538 = vmatprep.subr.mxu0 (!%p1539_p5), %v440_v0  ;;  %1651 = vmatprep.subr.mxu1 (!%p1539_p5), %v440_v0  ;;  %v407_v2 = vld [vmem:[%s2332_s3] sm:$0xff] (!%p1539_p5)  ;;  %v408_v5 = vld [vmem:[%s2332_s3 + $0x8] sm:$0xff] (!%p1539_p5)  ;;  %v425_v8 = vld [vmem:[%s2332_s3 + $0x90] sm:$0xff] (!%p1539_p5) }
  0x46   : > { %v423_v3 = vld [vmem:[%s2332_s3 + $0x80] sm:$0xff] (!%p1539_p5)  ;;  %539 = vmatpush1.msra.mxu0 (!%p1539_p5), %v439_v1  ;;  %1652 = vmatpush1.msra.mxu1 (!%p1539_p5), %v439_v1  ;;  %v424_v6 = vld [vmem:[%s2332_s3 + $0x88] sm:$0xff] (!%p1539_p5)  ;;  %v410_v9 = vld [vmem:[%s2332_s3 + $0x18] sm:$0xff] (!%p1539_p5) }
  0x47   : > { %602 = vmatprep.mubr.f32.mxu0 (!%p1539_p5), %v1896_v4  ;;  %698 = vmatprep.mubr.f32.mxu1 (!%p1539_p5), %v1896_v4  ;;  %v426_v10 = vld [vmem:[%s2332_s3 + $0x98] sm:$0xff] (!%p1539_p5)  ;;  %v411_v11 = vld [vmem:[%s2332_s3 + $0x20] sm:$0xff] (!%p1539_p5)  ;;  %v412_v13 = vld [vmem:[%s2332_s3 + $0x28] sm:$0xff] (!%p1539_p5) }
  0x48   : > { %1540 = vmatmul.mubr.msk.f32.vlgmr.msra.gmra.mrb[0].mxu0 (!%p1539_p5), %vm441_vm0, %v407_v2  ;;  %1556 = vmatmul.mubr.msk.f32.vlgmr.msra.gmra.mrb[0].mxu1 (!%p1539_p5), %vm441_vm0, %v423_v3  ;;  %v427_v12 = vld [vmem:[%s2332_s3 + $0xa0] sm:$0xff] (!%p1539_p5)  ;;  %v428_v14 = vld [vmem:[%s2332_s3 + $0xa8] sm:$0xff] (!%p1539_p5)  ;;  %v413_v15 = vld [vmem:[%s2332_s3 + $0x30] sm:$0xff] (!%p1539_p5) }
  0x49   : > { %608 = vmatprep.mubr.f32.mxu0 (!%p1539_p5), %v1896_v4  ;;  %704 = vmatprep.mubr.f32.mxu1 (!%p1539_p5), %v1896_v4  ;;  %v429_v16 = vld [vmem:[%s2332_s3 + $0xb0] sm:$0xff] (!%p1539_p5)  ;;  %v414_v17 = vld [vmem:[%s2332_s3 + $0x38] sm:$0xff] (!%p1539_p5)  ;;  %v415_v19 = vld [vmem:[%s2332_s3 + $0x40] sm:$0xff] (!%p1539_p5) }
  0x4a   : > { %v430_v18 = vld [vmem:[%s2332_s3 + $0xb8] sm:$0xff] (!%p1539_p5)  ;;  %v431_v20 = vld [vmem:[%s2332_s3 + $0xc0] sm:$0xff] (!%p1539_p5)  ;;  %v416_v21 = vld [vmem:[%s2332_s3 + $0x48] sm:$0xff] (!%p1539_p5) }
  0x4b   : > { %v432_v22 = vld [vmem:[%s2332_s3 + $0xc8] sm:$0xff] (!%p1539_p5)  ;;  %v417_v23 = vld [vmem:[%s2332_s3 + $0x50] sm:$0xff] (!%p1539_p5)  ;;  %v418_v25 = vld [vmem:[%s2332_s3 + $0x58] sm:$0xff] (!%p1539_p5) }
  0x4c   : > { %1541 = vmatmul.mubr.msk.f32.gmra.mrb[2].mxu0 %vm441_vm0, %v408_v5  ;;  %1557 = vmatmul.mubr.msk.f32.gmra.mrb[2].mxu1 %vm441_vm0, %v424_v6  ;;  %v433_v24 = vld [vmem:[%s2332_s3 + $0xd0] sm:$0xff]  ;;  %v434_v26 = vld [vmem:[%s2332_s3 + $0xd8] sm:$0xff]  ;;  %v419_v27 = vld [vmem:[%s2332_s3 + $0x60] sm:$0xff] }
  0x4d   : > { %614 = vmatprep.mubr.f32.mxu0 %v1896_v4  ;;  %710 = vmatprep.mubr.f32.mxu1 %v1896_v4  ;;  %v435_v28 = vld [vmem:[%s2332_s3 + $0xe0] sm:$0xff]  ;;  %v420_v29 = vld [vmem:[%s2332_s3 + $0x68] sm:$0xff]  ;;  %v421_v31 = vld [vmem:[%s2332_s3 + $0x70] sm:$0xff] }
  0x4e   : > { %v436_v30 = vld [vmem:[%s2332_s3 + $0xe8] sm:$0xff]  ;;  %v437_v32 = vld [vmem:[%s2332_s3 + $0xf0] sm:$0xff]  ;;  %v422_v33 = vld [vmem:[%s2332_s3 + $0x78] sm:$0xff] }
  0x4f   : > { %v438_v34 = vld [vmem:[%s2332_s3 + $0xf8] sm:$0xff] }
  0x50   : > { %1542 = vmatmul.mubr.msk.f32.gmra.mrb[4].mxu0 %vm441_vm0, %v409_v7  ;;  %1558 = vmatmul.mubr.msk.f32.gmra.mrb[4].mxu1 %vm441_vm0, %v425_v8 }
  0x51   : > { %620 = vmatprep.mubr.f32.mxu0 %v1896_v4  ;;  %716 = vmatprep.mubr.f32.mxu1 %v1896_v4 }
  0x54   : > { %1543 = vmatmul.mubr.msk.f32.gmra.mrb[6].mxu0 %vm441_vm0, %v410_v9  ;;  %1559 = vmatmul.mubr.msk.f32.gmra.mrb[6].mxu1 %vm441_vm0, %v426_v10 }
  0x55   : > { %626 = vmatprep.mubr.f32.mxu0 %v1896_v4  ;;  %722 = vmatprep.mubr.f32.mxu1 %v1896_v4 }
  0x58   : > { %1544 = vmatmul.mubr.msk.f32.gmra.mrb[8].mxu0 %vm441_vm0, %v411_v11  ;;  %1560 = vmatmul.mubr.msk.f32.gmra.mrb[8].mxu1 %vm441_vm0, %v427_v12 }
  0x59   : > { %632 = vmatprep.mubr.f32.mxu0 %v1896_v4  ;;  %728 = vmatprep.mubr.f32.mxu1 %v1896_v4 }
  0x5c   : > { %1545 = vmatmul.mubr.msk.f32.gmra.mrb[10].mxu0 %vm441_vm0, %v412_v13  ;;  %1561 = vmatmul.mubr.msk.f32.gmra.mrb[10].mxu1 %vm441_vm0, %v428_v14 }
  0x5d   : > { %638 = vmatprep.mubr.f32.mxu0 %v1896_v4  ;;  %734 = vmatprep.mubr.f32.mxu1 %v1896_v4 }
  0x60   : > { %1546 = vmatmul.mubr.msk.f32.gmra.mrb[12].mxu0 %vm441_vm0, %v413_v15  ;;  %1562 = vmatmul.mubr.msk.f32.gmra.mrb[12].mxu1 %vm441_vm0, %v429_v16 }
  0x61   : > { %644 = vmatprep.mubr.f32.mxu0 %v1896_v4  ;;  %740 = vmatprep.mubr.f32.mxu1 %v1896_v4 }
  0x64   : > { %1547 = vmatmul.mubr.msk.f32.gmra.mrb[14].mxu0 %vm441_vm0, %v414_v17  ;;  %1563 = vmatmul.mubr.msk.f32.gmra.mrb[14].mxu1 %vm441_vm0, %v430_v18 }
  0x65   : > { %650 = vmatprep.mubr.f32.mxu0 %v1896_v4  ;;  %746 = vmatprep.mubr.f32.mxu1 %v1896_v4 }
  0x68   : > { %1548 = vmatmul.mubr.msk.f32.gmra.mrb[16].mxu0 %vm441_vm0, %v415_v19  ;;  %1564 = vmatmul.mubr.msk.f32.gmra.mrb[16].mxu1 %vm441_vm0, %v431_v20 }
  0x69   : > { %656 = vmatprep.mubr.f32.mxu0 %v1896_v4  ;;  %752 = vmatprep.mubr.f32.mxu1 %v1896_v4 }
  0x6c   : > { %1549 = vmatmul.mubr.msk.f32.gmra.mrb[18].mxu0 %vm441_vm0, %v416_v21  ;;  %1565 = vmatmul.mubr.msk.f32.gmra.mrb[18].mxu1 %vm441_vm0, %v432_v22 }
  0x6d   : > { %662 = vmatprep.mubr.f32.mxu0 %v1896_v4  ;;  %758 = vmatprep.mubr.f32.mxu1 %v1896_v4 }
  0x70   : > { %1550 = vmatmul.mubr.msk.f32.gmra.mrb[20].mxu0 %vm441_vm0, %v417_v23  ;;  %1566 = vmatmul.mubr.msk.f32.gmra.mrb[20].mxu1 %vm441_vm0, %v433_v24 }
  0x71   : > { %668 = vmatprep.mubr.f32.mxu0 %v1896_v4  ;;  %764 = vmatprep.mubr.f32.mxu1 %v1896_v4 }
  0x74   : > { %1551 = vmatmul.mubr.msk.f32.gmra.mrb[22].mxu0 %vm441_vm0, %v418_v25  ;;  %1567 = vmatmul.mubr.msk.f32.gmra.mrb[22].mxu1 %vm441_vm0, %v434_v26 }
  0x75   : > { %674 = vmatprep.mubr.f32.mxu0 %v1896_v4  ;;  %770 = vmatprep.mubr.f32.mxu1 %v1896_v4 }
  0x78   : > { %1552 = vmatmul.mubr.msk.f32.gmra.mrb[24].mxu0 %vm441_vm0, %v419_v27  ;;  %1568 = vmatmul.mubr.msk.f32.gmra.mrb[24].mxu1 %vm441_vm0, %v435_v28 }
  0x79   : > { %680 = vmatprep.mubr.f32.mxu0 %v1896_v4  ;;  %776 = vmatprep.mubr.f32.mxu1 %v1896_v4 }
  0x7c   : > { %1553 = vmatmul.mubr.msk.f32.gmra.mrb[26].mxu0 %vm441_vm0, %v420_v29  ;;  %1569 = vmatmul.mubr.msk.f32.gmra.mrb[26].mxu1 %vm441_vm0, %v436_v30 }
  0x7d   : > { %686 = vmatprep.mubr.f32.mxu0 %v1896_v4  ;;  %782 = vmatprep.mubr.f32.mxu1 %v1896_v4 }
  0x80   : > { %1554 = vmatmul.mubr.msk.f32.gmra.mrb[28].mxu0 %vm441_vm0, %v421_v31  ;;  %1570 = vmatmul.mubr.msk.f32.gmra.mrb[28].mxu1 %vm441_vm0, %v437_v32 }
  0x81   : > { %692 = vmatprep.mubr.f32.mxu0 %v1896_v4  ;;  %788 = vmatprep.mubr.f32.mxu1 %v1896_v4 }
  0x84   : > { %1555 = vmatmul.mubr.msk.f32.gmra.mrb[30].mxu0 %vm441_vm0, %v422_v33  ;;  %1571 = vmatmul.mubr.msk.f32.gmra.mrb[30].mxu1 %vm441_vm0, %v438_v34 }
 0x11b   : > { %v604_v35 = vpop.f32.mrb[0].mxu0  ;;  %v700_v36 = vpop.f32.mrb[0].mxu1 }
 0x11c   : > { %v606_v37 = vpop.f32.mrb[1].mxu0  ;;  %v702_v38 = vpop.f32.mrb[1].mxu1 }
 0x11f   : > { %v610_v39 = vpop.f32.mrb[2].mxu0  ;;  %v706_v40 = vpop.f32.mrb[2].mxu1 }
 0x120   : > { %v795_v41 = vpack.c.bf16 %v610_v39, %v604_v35  ;;  %v811_v42 = vpack.c.bf16 %v706_v40, %v700_v36  ;;  %v612_v43 = vpop.f32.mrb[3].mxu0  ;;  %v708_v44 = vpop.f32.mrb[3].mxu1 }
 0x121   : > { %v796_v45 = vpack.c.bf16 %v612_v43, %v606_v37  ;;  %v812_v46 = vpack.c.bf16 %v708_v44, %v702_v38 }
 0x122   : > { %827 = vst [vmem:[#allocation2] sm:$0xff] %v795_v41  ;;  %843 = vst [vmem:[#allocation2 + $0x80] sm:$0xff] %v811_v42 }
 0x123   : > { %828 = vst [vmem:[#allocation2 + $0x8] sm:$0xff] %v796_v45  ;;  %844 = vst [vmem:[#allocation2 + $0x88] sm:$0xff] %v812_v46  ;;  %v616_v47 = vpop.f32.mrb[4].mxu0  ;;  %v712_v48 = vpop.f32.mrb[4].mxu1 }
 0x124   : > { %v618_v49 = vpop.f32.mrb[5].mxu0  ;;  %v714_v50 = vpop.f32.mrb[5].mxu1 }
 0x127   : > { %v622_v51 = vpop.f32.mrb[6].mxu0  ;;  %v718_v52 = vpop.f32.mrb[6].mxu1 }
 0x128   : > { %v797_v53 = vpack.c.bf16 %v622_v51, %v616_v47  ;;  %v813_v54 = vpack.c.bf16 %v718_v52, %v712_v48  ;;  %v624_v55 = vpop.f32.mrb[7].mxu0  ;;  %v720_v56 = vpop.f32.mrb[7].mxu1 }
 0x129   : > { %v798_v57 = vpack.c.bf16 %v624_v55, %v618_v49  ;;  %v814_v58 = vpack.c.bf16 %v720_v56, %v714_v50 }
 0x12a   : > { %829 = vst [vmem:[#allocation2 + $0x10] sm:$0xff] %v797_v53  ;;  %845 = vst [vmem:[#allocation2 + $0x90] sm:$0xff] %v813_v54 }
 0x12b   : > { %830 = vst [vmem:[#allocation2 + $0x18] sm:$0xff] %v798_v57  ;;  %846 = vst [vmem:[#allocation2 + $0x98] sm:$0xff] %v814_v58  ;;  %v628_v59 = vpop.f32.mrb[8].mxu0  ;;  %v724_v60 = vpop.f32.mrb[8].mxu1 }
 0x12c   : > { %v630_v61 = vpop.f32.mrb[9].mxu0  ;;  %v726_v62 = vpop.f32.mrb[9].mxu1 }
 0x12f   : > { %v634_v63 = vpop.f32.mrb[10].mxu0  ;;  %v730_v0 = vpop.f32.mrb[10].mxu1 }
 0x130   : > { %v799_v1 = vpack.c.bf16 %v634_v63, %v628_v59  ;;  %v815_v2 = vpack.c.bf16 %v730_v0, %v724_v60  ;;  %v636_v3 = vpop.f32.mrb[11].mxu0  ;;  %v732_v4 = vpop.f32.mrb[11].mxu1 }
 0x131   : > { %v800_v5 = vpack.c.bf16 %v636_v3, %v630_v61  ;;  %v816_v6 = vpack.c.bf16 %v732_v4, %v726_v62 }
 0x132   : > { %831 = vst [vmem:[#allocation2 + $0x20] sm:$0xff] %v799_v1  ;;  %847 = vst [vmem:[#allocation2 + $0xa0] sm:$0xff] %v815_v2 }
 0x133   : > { %832 = vst [vmem:[#allocation2 + $0x28] sm:$0xff] %v800_v5  ;;  %848 = vst [vmem:[#allocation2 + $0xa8] sm:$0xff] %v816_v6  ;;  %v640_v7 = vpop.f32.mrb[12].mxu0  ;;  %v736_v8 = vpop.f32.mrb[12].mxu1 }
 0x134   : > { %v642_v9 = vpop.f32.mrb[13].mxu0  ;;  %v738_v10 = vpop.f32.mrb[13].mxu1 }
 0x137   : > { %v646_v11 = vpop.f32.mrb[14].mxu0  ;;  %v742_v12 = vpop.f32.mrb[14].mxu1 }
 0x138   : > { %v801_v13 = vpack.c.bf16 %v646_v11, %v640_v7  ;;  %v817_v14 = vpack.c.bf16 %v742_v12, %v736_v8  ;;  %v648_v15 = vpop.f32.mrb[15].mxu0  ;;  %v744_v16 = vpop.f32.mrb[15].mxu1 }
 0x139   : > { %v802_v17 = vpack.c.bf16 %v648_v15, %v642_v9  ;;  %v818_v18 = vpack.c.bf16 %v744_v16, %v738_v10 }
 0x13a   : > { %833 = vst [vmem:[#allocation2 + $0x30] sm:$0xff] %v801_v13  ;;  %849 = vst [vmem:[#allocation2 + $0xb0] sm:$0xff] %v817_v14 }
 0x13b   : > { %834 = vst [vmem:[#allocation2 + $0x38] sm:$0xff] %v802_v17  ;;  %850 = vst [vmem:[#allocation2 + $0xb8] sm:$0xff] %v818_v18  ;;  %v652_v19 = vpop.f32.mrb[16].mxu0  ;;  %v748_v20 = vpop.f32.mrb[16].mxu1 }
 0x13c   : > { %v654_v21 = vpop.f32.mrb[17].mxu0  ;;  %v750_v22 = vpop.f32.mrb[17].mxu1 }
 0x13f   : > { %v658_v23 = vpop.f32.mrb[18].mxu0  ;;  %v754_v24 = vpop.f32.mrb[18].mxu1 }
 0x140   : > { %v803_v25 = vpack.c.bf16 %v658_v23, %v652_v19  ;;  %v819_v26 = vpack.c.bf16 %v754_v24, %v748_v20  ;;  %v660_v27 = vpop.f32.mrb[19].mxu0  ;;  %v756_v28 = vpop.f32.mrb[19].mxu1 }
 0x141   : > { %v804_v29 = vpack.c.bf16 %v660_v27, %v654_v21  ;;  %v820_v30 = vpack.c.bf16 %v756_v28, %v750_v22 }
 0x142   : > { %835 = vst [vmem:[#allocation2 + $0x40] sm:$0xff] %v803_v25  ;;  %851 = vst [vmem:[#allocation2 + $0xc0] sm:$0xff] %v819_v26 }
 0x143   : > { %836 = vst [vmem:[#allocation2 + $0x48] sm:$0xff] %v804_v29  ;;  %852 = vst [vmem:[#allocation2 + $0xc8] sm:$0xff] %v820_v30  ;;  %v664_v31 = vpop.f32.mrb[20].mxu0  ;;  %v760_v32 = vpop.f32.mrb[20].mxu1 }
 0x144   : > { %v666_v33 = vpop.f32.mrb[21].mxu0  ;;  %v762_v34 = vpop.f32.mrb[21].mxu1 }
 0x147   : > { %v670_v35 = vpop.f32.mrb[22].mxu0  ;;  %v766_v36 = vpop.f32.mrb[22].mxu1 }
 0x148   : > { %v805_v37 = vpack.c.bf16 %v670_v35, %v664_v31  ;;  %v821_v38 = vpack.c.bf16 %v766_v36, %v760_v32  ;;  %v672_v39 = vpop.f32.mrb[23].mxu0  ;;  %v768_v40 = vpop.f32.mrb[23].mxu1 }
 0x149   : > { %v806_v41 = vpack.c.bf16 %v672_v39, %v666_v33  ;;  %v822_v42 = vpack.c.bf16 %v768_v40, %v762_v34 }
 0x14a   : > { %837 = vst [vmem:[#allocation2 + $0x50] sm:$0xff] %v805_v37  ;;  %853 = vst [vmem:[#allocation2 + $0xd0] sm:$0xff] %v821_v38 }
 0x14b   : > { %838 = vst [vmem:[#allocation2 + $0x58] sm:$0xff] %v806_v41  ;;  %854 = vst [vmem:[#allocation2 + $0xd8] sm:$0xff] %v822_v42  ;;  %v676_v43 = vpop.f32.mrb[24].mxu0  ;;  %v772_v44 = vpop.f32.mrb[24].mxu1 }
 0x14c   : > { %v678_v45 = vpop.f32.mrb[25].mxu0  ;;  %v774_v46 = vpop.f32.mrb[25].mxu1 }
 0x14f   : > { %v682_v47 = vpop.f32.mrb[26].mxu0  ;;  %v778_v48 = vpop.f32.mrb[26].mxu1 }
 0x150   : > { %v807_v49 = vpack.c.bf16 %v682_v47, %v676_v43  ;;  %v823_v50 = vpack.c.bf16 %v778_v48, %v772_v44  ;;  %v684_v51 = vpop.f32.mrb[27].mxu0  ;;  %v780_v52 = vpop.f32.mrb[27].mxu1 }
 0x151   : > { %v808_v53 = vpack.c.bf16 %v684_v51, %v678_v45  ;;  %v824_v54 = vpack.c.bf16 %v780_v52, %v774_v46 }
 0x152   : > { %839 = vst [vmem:[#allocation2 + $0x60] sm:$0xff] %v807_v49  ;;  %855 = vst [vmem:[#allocation2 + $0xe0] sm:$0xff] %v823_v50 }
 0x153   : > { %840 = vst [vmem:[#allocation2 + $0x68] sm:$0xff] %v808_v53  ;;  %856 = vst [vmem:[#allocation2 + $0xe8] sm:$0xff] %v824_v54  ;;  %v688_v55 = vpop.f32.mrb[28].mxu0  ;;  %v784_v56 = vpop.f32.mrb[28].mxu1 }
 0x154   : > { %v690_v57 = vpop.f32.mrb[29].mxu0  ;;  %v786_v58 = vpop.f32.mrb[29].mxu1 }
 0x157   : > { %v694_v59 = vpop.f32.mrb[30].mxu0  ;;  %v790_v60 = vpop.f32.mrb[30].mxu1 }
 0x158   : > { %v809_v61 = vpack.c.bf16 %v694_v59, %v688_v55  ;;  %v825_v62 = vpack.c.bf16 %v790_v60, %v784_v56  ;;  %v696_v63 = vpop.f32.mrb[31].mxu0  ;;  %v792_v0 = vpop.f32.mrb[31].mxu1 }
 0x159   : > { %v810_v1 = vpack.c.bf16 %v696_v63, %v690_v57  ;;  %v826_v2 = vpack.c.bf16 %v792_v0, %v786_v58 }
 0x15a   : > { %841 = vst [vmem:[#allocation2 + $0x70] sm:$0xff] %v809_v61  ;;  %857 = vst [vmem:[#allocation2 + $0xf0] sm:$0xff] %v825_v62 }
 0x15b   : > { %842 = vst [vmem:[#allocation2 + $0x78] sm:$0xff] %v810_v1  ;;  %858 = vst [vmem:[#allocation2 + $0xf8] sm:$0xff] %v826_v2 }
 0x15c PF: > { %v1740_v3 = vld [vmem:[%s2044_s20 + $0x4] ss:$8 sps:$4 sm:$0xff]   ;;  %v1744_v5 = vld [vmem:[%s2044_s20] ss:$8 sps:$4 sm:$0xff]   ;;  %v1746_v7 = vld [vmem:[%s2044_s20 + $0x14] ss:$8 sps:$4 sm:$0xff]  }
 0x15d   : > { %v1742_v4 = vld [vmem:[%s2044_s20 + $0x84] ss:$8 sps:$4 sm:$0xff]   ;;  %972 = vmatprep.subr.bf16.mxu0 %v1740_v3  ;;  %v1745_v6 = vld [vmem:[%s2044_s20 + $0x80] ss:$8 sps:$4 sm:$0xff]   ;;  %v1748_v8 = vld [vmem:[%s2044_s20 + $0x94] ss:$8 sps:$4 sm:$0xff]  }
 0x15e   : > { %1198 = vmatprep.subr.bf16.mxu1 %v1742_v4  ;;  %973 = vmatpush1.bf16.xpose.msra.mxu0 %v1744_v5  ;;  %v1750_v9 = vld [vmem:[%s2044_s20 + $0x10] ss:$8 sps:$4 sm:$0xff]   ;;  %v1752_v11 = vld [vmem:[%s2044_s20 + $0x24] ss:$8 sps:$4 sm:$0xff]   ;;  %v1756_v13 = vld [vmem:[%s2044_s20 + $0x20] ss:$8 sps:$4 sm:$0xff]  }
 0x15f   : > { %1199 = vmatpush1.bf16.xpose.msra.mxu1 %v1745_v6  ;;  %974 = vmatprep.subr.bf16.mxu0 %v1746_v7  ;;  %v1751_v10 = vld [vmem:[%s2044_s20 + $0x90] ss:$8 sps:$4 sm:$0xff]   ;;  %v1754_v12 = vld [vmem:[%s2044_s20 + $0xa4] ss:$8 sps:$4 sm:$0xff]   ;;  %v1757_v14 = vld [vmem:[%s2044_s20 + $0xa0] ss:$8 sps:$4 sm:$0xff]  }
 0x160   : > { %1200 = vmatprep.subr.bf16.mxu1 %v1748_v8  ;;  %v1758_v15 = vld [vmem:[%s2044_s20 + $0x34] ss:$8 sps:$4 sm:$0xff]   ;;  %v861_v17 = vld [vmem:[#allocation2 + $0x8] sm:$0xff]  ;;  %v1762_v19 = vld [vmem:[%s2044_s20 + $0x30] ss:$8 sps:$4 sm:$0xff]   ;;  %s859_s8 = sld [smem:[#allocation4]] }
 0x161   : > { %v1760_v16 = vld [vmem:[%s2044_s20 + $0xb4] ss:$8 sps:$4 sm:$0xff]   ;;  %v1086_v18 = vld [vmem:[#allocation2 + $0x88] sm:$0xff]  ;;  %1004 = vmatprep.mubr.bf16.mxu0 %v861_v17  ;;  %v1763_v20 = vld [vmem:[%s2044_s20 + $0xb0] ss:$8 sps:$4 sm:$0xff]   ;;  %s1623_s11 = sshll.u32 %s1876_s27, 1 }
 0x162   : > { %1230 = vmatprep.mubr.bf16.mxu1 %v1086_v18  ;;  %v1764_v21 = vld [vmem:[%s2044_s20 + $0x44] ss:$8 sps:$4 sm:$0xff]   ;;  %v1768_v23 = vld [vmem:[%s2044_s20 + $0x40] ss:$8 sps:$4 sm:$0xff]   ;;  %v1770_v25 = vld [vmem:[%s2044_s20 + $0x54] ss:$8 sps:$4 sm:$0xff]   ;;  %s1394_s19 = sadd.s32 %s1872_s26, %s1623_s11 }
 0x163   : > { %v1766_v22 = vld [vmem:[%s2044_s20 + $0xc4] ss:$8 sps:$4 sm:$0xff]   ;;  %v1769_v24 = vld [vmem:[%s2044_s20 + $0xc0] ss:$8 sps:$4 sm:$0xff]   ;;  %v1772_v26 = vld [vmem:[%s2044_s20 + $0xd4] ss:$8 sps:$4 sm:$0xff]  }
 0x164   : > { %v1774_v27 = vld [vmem:[%s2044_s20 + $0x50] ss:$8 sps:$4 sm:$0xff]   ;;  %v1776_v29 = vld [vmem:[%s2044_s20 + $0x64] ss:$8 sps:$4 sm:$0xff]   ;;  %v1780_v31 = vld [vmem:[%s2044_s20 + $0x60] ss:$8 sps:$4 sm:$0xff]  }
 0x165   : > { %v1775_v28 = vld [vmem:[%s2044_s20 + $0xd0] ss:$8 sps:$4 sm:$0xff]   ;;  %v1778_v30 = vld [vmem:[%s2044_s20 + $0xe4] ss:$8 sps:$4 sm:$0xff]   ;;  %v1781_v32 = vld [vmem:[%s2044_s20 + $0xe0] ss:$8 sps:$4 sm:$0xff]  }
 0x166   : > { %975 = vmatpush1.bf16.xpose.msra.mxu0 %v1750_v9  ;;  %v1782_v33 = vld [vmem:[%s2044_s20 + $0x74] ss:$8 sps:$4 sm:$0xff]   ;;  %v1786_v35 = vld [vmem:[%s2044_s20 + $0x70] ss:$8 sps:$4 sm:$0xff]   ;;  %v860_v37 = vld [vmem:[#allocation2] sm:$0xff]  ;;  %s1624_s10 = sshll.u32 %s1394_s19, 7 }
 0x167   : > { %1201 = vmatpush1.bf16.xpose.msra.mxu1 %v1751_v10  ;;  %976 = vmatprep.subr.bf16.mxu0 %v1752_v11  ;;  %v1784_v34 = vld [vmem:[%s2044_s20 + $0xf4] ss:$8 sps:$4 sm:$0xff]   ;;  %v1787_v36 = vld [vmem:[%s2044_s20 + $0xf0] ss:$8 sps:$4 sm:$0xff]   ;;  %v1085_v38 = vld [vmem:[#allocation2 + $0x80] sm:$0xff]  ;;  %s1398_s2 = sshll.u32 %s2063_s9, 4  ;;  %s2274_s22 = scalar_lea.hbm %s2335_s6, %s1624_s10  ;;  %s2276_s2 = int_to_ptr.vmem [resolvable:$true] %s1398_s2 }
 0x168   : > { %1202 = vmatprep.subr.bf16.mxu1 %v1754_v12  ;;  %v863_v39 = vld [vmem:[#allocation2 + $0x18] sm:$0xff]  ;;  %v862_v41 = vld [vmem:[#allocation2 + $0x10] sm:$0xff]  ;;  %v865_v43 = vld [vmem:[#allocation2 + $0x28] sm:$0xff]  ;;  %s1381_s26 = scalar_lea.sflag [#allocation7], %s2040_s28  ;;  %s1790_s27 = scalar_lea.vmem %s2276_s2, 128 }
 0x169   : > { %v1088_v40 = vld [vmem:[#allocation2 + $0x98] sm:$0xff]  ;;  %v1087_v42 = vld [vmem:[#allocation2 + $0x90] sm:$0xff]  ;;  %v1090_v44 = vld [vmem:[#allocation2 + $0xa8] sm:$0xff]  ;;  %p1791_p6 = scmp.ne.s32.totalorder %s2276_s2, %s1790_s27 }
 0x16a   : > { %v864_v45 = vld [vmem:[#allocation2 + $0x20] sm:$0xff]  ;;  %v867_v47 = vld [vmem:[#allocation2 + $0x38] sm:$0xff]  ;;  %v866_v49 = vld [vmem:[#allocation2 + $0x30] sm:$0xff] }
 0x16b   : > { %v1089_v46 = vld [vmem:[#allocation2 + $0xa0] sm:$0xff]  ;;  %v1092_v48 = vld [vmem:[#allocation2 + $0xb8] sm:$0xff]  ;;  %v1091_v50 = vld [vmem:[#allocation2 + $0xb0] sm:$0xff]  ;;  %p1792_p7 = pnand %p1791_p6, %p2000_p9 }
 0x16c   : > { %v869_v51 = vld [vmem:[#allocation2 + $0x48] sm:$0xff]  ;;  %v868_v53 = vld [vmem:[#allocation2 + $0x40] sm:$0xff]  ;;  %v871_v55 = vld [vmem:[#allocation2 + $0x58] sm:$0xff] }
 0x16d   : > { %v1094_v52 = vld [vmem:[#allocation2 + $0xc8] sm:$0xff]  ;;  %v1093_v54 = vld [vmem:[#allocation2 + $0xc0] sm:$0xff]  ;;  %v1096_v56 = vld [vmem:[#allocation2 + $0xd8] sm:$0xff]  ;;  %p1793_p8 = pneg %p1792_p7 }
 0x16e   : > { %977 = vmatpush1.bf16.xpose.msra.mxu0 %v1756_v13  ;;  %v870_v57 = vld [vmem:[#allocation2 + $0x50] sm:$0xff]  ;;  %v873_v59 = vld [vmem:[#allocation2 + $0x68] sm:$0xff]  ;;  %v872_v61 = vld [vmem:[#allocation2 + $0x60] sm:$0xff] }
 0x16f   : > { %1203 = vmatpush1.bf16.xpose.msra.mxu1 %v1757_v14  ;;  %978 = vmatprep.subr.bf16.mxu0 %v1758_v15  ;;  %v1095_v58 = vld [vmem:[#allocation2 + $0xd0] sm:$0xff]  ;;  %v1098_v60 = vld [vmem:[#allocation2 + $0xe8] sm:$0xff]  ;;  %v1097_v62 = vld [vmem:[#allocation2 + $0xe0] sm:$0xff] }
 0x170   : > { %1204 = vmatprep.subr.bf16.mxu1 %v1760_v16  ;;  %v875_v63 = vld [vmem:[#allocation2 + $0x78] sm:$0xff]  ;;  %v874_v1 = vld [vmem:[#allocation2 + $0x70] sm:$0xff]  ;;  %v2261_v3 = vld [vmem:[%s2333_s4] sm:$0xff] }
 0x171   : > { %v1100_v0 = vld [vmem:[#allocation2 + $0xf8] sm:$0xff]  ;;  %v1099_v2 = vld [vmem:[#allocation2 + $0xf0] sm:$0xff]  ;;  %v1621_v4 = vcombine.high %v2261_v3, %v2261_v3 }
 0x176   : > { %979 = vmatpush1.bf16.xpose.msra.mxu0 %v1762_v19 }
 0x177   : > { %1205 = vmatpush1.bf16.xpose.msra.mxu1 %v1763_v20  ;;  %980 = vmatprep.subr.bf16.mxu0 %v1764_v21 }
 0x178   : > { %1206 = vmatprep.subr.bf16.mxu1 %v1766_v22 }
 0x17e   : > { %981 = vmatpush1.bf16.xpose.msra.mxu0 %v1768_v23 }
 0x17f   : > { %1207 = vmatpush1.bf16.xpose.msra.mxu1 %v1769_v24  ;;  %982 = vmatprep.subr.bf16.mxu0 %v1770_v25 }
 0x180   : > { %1208 = vmatprep.subr.bf16.mxu1 %v1772_v26 }
 0x186   : > { %983 = vmatpush1.bf16.xpose.msra.mxu0 %v1774_v27 }
 0x187   : > { %1209 = vmatpush1.bf16.xpose.msra.mxu1 %v1775_v28  ;;  %984 = vmatprep.subr.bf16.mxu0 %v1776_v29 }
 0x188   : > { %1210 = vmatprep.subr.bf16.mxu1 %v1778_v30 }
 0x18e   : > { %985 = vmatpush1.bf16.xpose.msra.mxu0 %v1780_v31 }
 0x18f   : > { %1211 = vmatpush1.bf16.xpose.msra.mxu1 %v1781_v32  ;;  %986 = vmatprep.subr.bf16.mxu0 %v1782_v33 }
 0x190   : > { %1212 = vmatprep.subr.bf16.mxu1 %v1784_v34 }
 0x196   : > { %987 = vmatpush1.bf16.xpose.msra.mxu0 %v1786_v35 }
 0x197   : > { %1213 = vmatpush1.bf16.xpose.msra.mxu1 %v1787_v36 }
 0x19d   : > { %1005 = vmatmul.mubr.bf16.vlgmr.msra.gmra.mrb[0].mxu0 %v860_v37 }
 0x19e   : > { %1231 = vmatmul.mubr.bf16.vlgmr.msra.gmra.mrb[0].mxu1 %v1085_v38  ;;  %1012 = vmatprep.mubr.bf16.mxu0 %v863_v39 }
 0x19f   : > { %1238 = vmatprep.mubr.bf16.mxu1 %v1088_v40 }
 0x1a5   : > { %1013 = vmatmul.mubr.bf16.gmra.mrb[4].mxu0 %v862_v41 }
 0x1a6   : > { %1239 = vmatmul.mubr.bf16.gmra.mrb[4].mxu1 %v1087_v42  ;;  %1020 = vmatprep.mubr.bf16.mxu0 %v865_v43 }
 0x1a7   : > { %1246 = vmatprep.mubr.bf16.mxu1 %v1090_v44 }
 0x1ad   : > { %1021 = vmatmul.mubr.bf16.gmra.mrb[8].mxu0 %v864_v45 }
 0x1ae   : > { %1247 = vmatmul.mubr.bf16.gmra.mrb[8].mxu1 %v1089_v46  ;;  %1028 = vmatprep.mubr.bf16.mxu0 %v867_v47 }
 0x1af   : > { %1254 = vmatprep.mubr.bf16.mxu1 %v1092_v48 }
 0x1b5   : > { %1029 = vmatmul.mubr.bf16.gmra.mrb[12].mxu0 %v866_v49 }
 0x1b6   : > { %1255 = vmatmul.mubr.bf16.gmra.mrb[12].mxu1 %v1091_v50  ;;  %1036 = vmatprep.mubr.bf16.mxu0 %v869_v51 }
 0x1b7   : > { %1262 = vmatprep.mubr.bf16.mxu1 %v1094_v52 }
 0x1bd   : > { %1037 = vmatmul.mubr.bf16.gmra.mrb[16].mxu0 %v868_v53 }
 0x1be   : > { %1263 = vmatmul.mubr.bf16.gmra.mrb[16].mxu1 %v1093_v54  ;;  %1044 = vmatprep.mubr.bf16.mxu0 %v871_v55 }
 0x1bf   : > { %1270 = vmatprep.mubr.bf16.mxu1 %v1096_v56 }
 0x1c5   : > { %1045 = vmatmul.mubr.bf16.gmra.mrb[20].mxu0 %v870_v57 }
 0x1c6   : > { %1271 = vmatmul.mubr.bf16.gmra.mrb[20].mxu1 %v1095_v58  ;;  %1052 = vmatprep.mubr.bf16.mxu0 %v873_v59 }
 0x1c7   : > { %1278 = vmatprep.mubr.bf16.mxu1 %v1098_v60 }
 0x1cd   : > { %1053 = vmatmul.mubr.bf16.gmra.mrb[24].mxu0 %v872_v61 }
 0x1ce   : > { %1279 = vmatmul.mubr.bf16.gmra.mrb[24].mxu1 %v1097_v62  ;;  %1060 = vmatprep.mubr.bf16.mxu0 %v875_v63 }
 0x1cf   : > { %1286 = vmatprep.mubr.bf16.mxu1 %v1100_v0 }
 0x1d5   : > { %1061 = vmatmul.mubr.bf16.gmra.mrb[28].mxu0 %v874_v1 }
 0x1d6   : > { %1287 = vmatmul.mubr.bf16.gmra.mrb[28].mxu1 %v1099_v2  ;;  %1367 = vmatprep.mubr.bf16.mxu0 %v1621_v4 }
 0x270   : > { %v1006_v5 = vpop.f32.mrb[0].mxu0 }
 0x271   : > { %v1232_v6 = vpop.f32.mrb[0].mxu1  ;;  %v1008_v7 = vpop.f32.mrb[1].mxu0 }
 0x272   : > { %v1234_v8 = vpop.f32.mrb[1].mxu1  ;;  %v1009_v9 = vpop.f32.mrb[2].mxu0 }
 0x273   : > { %v1235_v10 = vpop.f32.mrb[2].mxu1  ;;  %v1069_v11 = vpack.c.bf16 %v1009_v9, %v1006_v5  ;;  %v1011_v13 = vpop.f32.mrb[3].mxu0 }
 0x274   : > { %v1295_v12 = vpack.c.bf16 %v1235_v10, %v1232_v6  ;;  %v1237_v14 = vpop.f32.mrb[3].mxu1 }
 0x276   : > { %1629 = vmatprep.subr.bf16.mxu0 %v1295_v12 }
 0x277   : > { %1630 = vmatpush3.bf16.msra.mxu0 %v1069_v11 }
 0x278   : > { %v1014_v15 = vpop.f32.mrb[4].mxu0 }
 0x279   : > { %v1240_v16 = vpop.f32.mrb[4].mxu1  ;;  %v1016_v17 = vpop.f32.mrb[5].mxu0 }
 0x27a   : > { %v1242_v18 = vpop.f32.mrb[5].mxu1  ;;  %v1017_v19 = vpop.f32.mrb[6].mxu0 }
 0x27b   : > { %v1243_v20 = vpop.f32.mrb[6].mxu1  ;;  %v1070_v21 = vpack.c.bf16 %v1017_v19, %v1014_v15  ;;  %v1019_v23 = vpop.f32.mrb[7].mxu0 }
 0x27c   : > { %v1296_v22 = vpack.c.bf16 %v1243_v20, %v1240_v16  ;;  %v1245_v24 = vpop.f32.mrb[7].mxu1 }
 0x27e   : > { %1631 = vmatprep.subr.bf16.mxu0 %v1296_v22  ;;  %v1620_v22 = vcombine.low %v2261_v3, %v2261_v3 }
 0x27f   : > { %1632 = vmatpush3.bf16.msra.mxu0 %v1070_v21 }
 0x280   : > { %v1022_v25 = vpop.f32.mrb[8].mxu0 }
 0x281   : > { %v1248_v26 = vpop.f32.mrb[8].mxu1  ;;  %v1024_v27 = vpop.f32.mrb[9].mxu0 }
 0x282   : > { %v1250_v28 = vpop.f32.mrb[9].mxu1  ;;  %v1025_v29 = vpop.f32.mrb[10].mxu0 }
 0x283   : > { %v1251_v30 = vpop.f32.mrb[10].mxu1  ;;  %v1071_v31 = vpack.c.bf16 %v1025_v29, %v1022_v25  ;;  %v1027_v33 = vpop.f32.mrb[11].mxu0  ;;  %v1376_v25 = vstv %s859_s8  ;;  %v1375_v29 = vld [vmem:[%s2061_s14] sm:$0xff]  ;;  %s1897_s14 = smov [#allocation8]  }
 0x284   : > { %v1297_v32 = vpack.c.bf16 %v1251_v30, %v1248_v26  ;;  %v1253_v34 = vpop.f32.mrb[11].mxu1  ;;  %s1794_s5 = sshll.u32 %s1897_s14, 4  ;;  %s1795_s5 = int_to_ptr.vmem [resolvable:$false] %s1794_s5 }
 0x285   : > { %s1796_s7 = scalar_lea.vmem %s1795_s5, 256  ;;  %p1797_p10 = scmp.lt.s32.totalorder %s2276_s2, %s1795_s5 }
 0x286   : > { %1633 = vmatprep.subr.bf16.mxu0 %v1297_v32  ;;  %p1798_p11 = scmp.lt.s32.totalorder %s1796_s7, %s1790_s27 }
 0x287   : > { %1634 = vmatpush3.bf16.msra.mxu0 %v1071_v31 }
 0x288   : > { %v1030_v35 = vpop.f32.mrb[12].mxu0  ;;  %p1799_p13 = por %p1798_p11, %p1797_p10 }
 0x289   : > { %v1256_v36 = vpop.f32.mrb[12].mxu1  ;;  %v1032_v37 = vpop.f32.mrb[13].mxu0 }
 0x28a   : > { %v1258_v38 = vpop.f32.mrb[13].mxu1  ;;  %v1033_v39 = vpop.f32.mrb[14].mxu0  ;;  %p1800_p0 = pnand %p1799_p13, %p1793_p8 }
 0x28b   : > { %v1259_v40 = vpop.f32.mrb[14].mxu1  ;;  %v1072_v41 = vpack.c.bf16 %v1033_v39, %v1030_v35  ;;  %v1035_v43 = vpop.f32.mrb[15].mxu0 }
 0x28c   : > { %v1298_v42 = vpack.c.bf16 %v1259_v40, %v1256_v36  ;;  %v1261_v44 = vpop.f32.mrb[15].mxu1 }
 0x28e   : > { %1635 = vmatprep.subr.bf16.mxu0 %v1298_v42 }
 0x28f   : > { %1636 = vmatpush3.bf16.msra.mxu0 %v1072_v41 }
 0x290   : > { %v1038_v45 = vpop.f32.mrb[16].mxu0 }
 0x291   : > { %v1264_v46 = vpop.f32.mrb[16].mxu1  ;;  %v1040_v47 = vpop.f32.mrb[17].mxu0 }
 0x292   : > { %v1266_v48 = vpop.f32.mrb[17].mxu1  ;;  %v1041_v49 = vpop.f32.mrb[18].mxu0 }
 0x293   : > { %v1267_v50 = vpop.f32.mrb[18].mxu1  ;;  %v1073_v51 = vpack.c.bf16 %v1041_v49, %v1038_v45  ;;  %v1043_v53 = vpop.f32.mrb[19].mxu0 }
 0x294   : > { %v1299_v52 = vpack.c.bf16 %v1267_v50, %v1264_v46  ;;  %v1269_v54 = vpop.f32.mrb[19].mxu1 }
 0x296   : > { %1637 = vmatprep.subr.bf16.mxu0 %v1299_v52 }
 0x297   : > { %1638 = vmatpush3.bf16.msra.mxu0 %v1073_v51 }
 0x298   : > { %v1046_v55 = vpop.f32.mrb[20].mxu0 }
 0x299   : > { %v1272_v56 = vpop.f32.mrb[20].mxu1  ;;  %v1048_v57 = vpop.f32.mrb[21].mxu0 }
 0x29a   : > { %v1274_v58 = vpop.f32.mrb[21].mxu1  ;;  %v1049_v59 = vpop.f32.mrb[22].mxu0 }
 0x29b   : > { %v1275_v60 = vpop.f32.mrb[22].mxu1  ;;  %v1074_v61 = vpack.c.bf16 %v1049_v59, %v1046_v55  ;;  %v1051_v63 = vpop.f32.mrb[23].mxu0 }
 0x29c   : > { %v1300_v62 = vpack.c.bf16 %v1275_v60, %v1272_v56  ;;  %v1277_v0 = vpop.f32.mrb[23].mxu1 }
 0x29e   : > { %1639 = vmatprep.subr.bf16.mxu0 %v1300_v62 }
 0x29f   : > { %1640 = vmatpush3.bf16.msra.mxu0 %v1074_v61 }
 0x2a0   : > { %v1054_v1 = vpop.f32.mrb[24].mxu0 }
 0x2a1   : > { %v1280_v2 = vpop.f32.mrb[24].mxu1  ;;  %v1056_v4 = vpop.f32.mrb[25].mxu0 }
 0x2a2   : > { %v1282_v5 = vpop.f32.mrb[25].mxu1  ;;  %v1057_v6 = vpop.f32.mrb[26].mxu0 }
 0x2a3   : > { %v1283_v7 = vpop.f32.mrb[26].mxu1  ;;  %v1075_v8 = vpack.c.bf16 %v1057_v6, %v1054_v1  ;;  %v1059_v10 = vpop.f32.mrb[27].mxu0 }
 0x2a4   : > { %v1301_v9 = vpack.c.bf16 %v1283_v7, %v1280_v2  ;;  %v1285_v11 = vpop.f32.mrb[27].mxu1 }
 0x2a6   : > { %1641 = vmatprep.subr.bf16.mxu0 %v1301_v9 }
 0x2a7   : > { %1642 = vmatpush3.bf16.msra.mxu0 %v1075_v8 }
 0x2a8   : > { %v1062_v12 = vpop.f32.mrb[28].mxu0 }
 0x2a9   : > { %v1288_v13 = vpop.f32.mrb[28].mxu1  ;;  %v1064_v14 = vpop.f32.mrb[29].mxu0 }
 0x2aa   : > { %v1290_v15 = vpop.f32.mrb[29].mxu1  ;;  %v1065_v16 = vpop.f32.mrb[30].mxu0 }
 0x2ab   : > { %v1291_v17 = vpop.f32.mrb[30].mxu1  ;;  %v1076_v18 = vpack.c.bf16 %v1065_v16, %v1062_v12  ;;  %v1067_v20 = vpop.f32.mrb[31].mxu0 }
 0x2ac   : > { %v1302_v19 = vpack.c.bf16 %v1291_v17, %v1288_v13  ;;  %v1293_v21 = vpop.f32.mrb[31].mxu1 }
 0x2ae   : > { %1643 = vmatprep.subr.bf16.mxu0 %v1302_v19 }
 0x2af   : > { %1644 = vmatpush3.bf16.msra.mxu0 %v1076_v18 }
 0x2b2   : > { %1368 = vmatmul.mubr.bf16.vlgmr.msra.gmra.mrb[32].mxu0 %v1620_v22 }
 0x385   : > { %v1645_v23 = vpop.f32.mrb[32].mxu0 }
 0x386   : > { %v1646_v24 = vpop.f32.mrb[33].mxu0 }
 0x387   : > { %v1647_v26 = vadd.f32 %v1646_v24, %v1645_v23  ;;  %v1648_v27 = vpop.f32.mrb[34].mxu0 }
 0x388   : > { %v1649_v28 = vpop.f32.mrb[35].mxu0 }
 0x389   : > { %v1377_v30 = vmul.f32 %v1647_v26, %v1376_v25 }
 0x38b   : > { %v1378_v31 = vadd.f32 %v1377_v30, %v1375_v29 }
 0x38d   : > { %1379 = vst [vmem:[%s2063_s9] sm:$0xff] %v1378_v31 }
 0x38e   : > { %1803 = shalt.err (!%p1800_p0)
}
 0x38f   : > { %s1804_s28 = scalar_lea.hbm %s2274_s22, 128  ;;  %s1808_s16 = scalar_lea.hbm %s2335_s6, 512 }
 0x390   : > { %p1805_p1 = scmp.ne.s32.totalorder %s2274_s22, %s1804_s28  ;;  %p1809_p4 = scmp.lt.u32.totalorder %s2274_s22, %s2335_s6 }
 0x391   : > { %p1810_p5 = scmp.lt.u32.totalorder %s1808_s16, %s1804_s28  ;;  %p1812_p7 = scmp.lt.u32.totalorder %s1804_s28, %s2274_s22 }
 0x392   : > { %p1806_p2 = pnand %p1805_p1, %p2000_p9 }
 0x393   : > { %p1811_p6 = por %p1810_p5, %p1809_p4 }
 0x394   : > { %p1807_p3 = pneg %p1806_p2 }
 0x395   : > { %p1813_p8 = por %p1812_p7, %p1811_p6 }
 0x397   : > { %p1814_p10 = pnand %p1813_p8, %p1807_p3 }
 0x399   : > { %1817 = shalt.err (!%p1814_p10)
}
 0x39a   : > { %1662 = dma.vmem_to_hbm [thread:$0]  (%p2000_p9), %s2276_s2, 128, %s2274_s22, %s1381_s26  }
 0x39b PF: > { %p1668_p11 = scmp.ge.s32.totalorder %s1888_s30, 2  ;;  %s1410_s8 = sand.u32 1, %s1860_s23  }
 0x39c   : > { %s1411_s11 = scalar_lea.sflag [#allocation7], %s1410_s8 }
 0x39d   : > { %p1665_p13 = pnand %p1668_p11, %p2007_p12 }
 0x39f   : > { %1855 = dma.done.wait (!%p1665_p13), %s1411_s11, 128  }
 0x3a0   : > { %1857 = vsyncadd (!%p1665_p13), %s1411_s11, 4294967168  ;;  %s23_s30 = sadd.s32 1, %s1888_s30   ;;  %s2350_s26 = sld [smem:[#allocation14_spill]] }
 0x3a1   : > { %p20_p0 = scmp.ge.s32.totalorder %s23_s30, 6   ;;  %s2351_s27 = sld [smem:[#allocation15_spill]] }
 0x3a2   : > { %s2352_s28 = sld [smem:[#allocation16_spill]]  ;;  %s2353_s29 = sld [smem:[#allocation17_spill]] }
 0x3a3   : > { %s2354_s23 = smov %s1864_s24  ;;  %s2355_s24 = smov %s1868_s25 }
 0x3a4   : > { %s2356_s25 = smov %s2012_s18  ;;  %22 = sbr.rel (!%p20_p0) target bundleno = 10 (0xa), region = 105 }
 0x3ab   :  { %1416 = vsyncpa [#allocation6], 1 }
 0x3ac   :  { %1418 = vsyncpa [#allocation6 + $0x1], 1 }
 0x3ad   :  { %1419 = vsyncpa [#allocation7], 1 }
 0x3ae   :  { %1421 = vsyncpa [#allocation7 + $0x1], 1 }

// kernel: tpu_custom_call.1
= control target key start
LH: loop header
LB: loop body
LE: loop exit
PB: predicated region body
PF: predicated region fallthrough
CT: control target
= control target key end

     0   :  { %s2329_s0 = inlined_call_operand.vmem [shape: f32[2,8,256], index: 0, kind: input, shape index: {}]   ;;  %s2330_s1 = inlined_call_operand.vmem [shape: f32[2,8,256], index: 1, kind: input, shape index: {}]   ;;  %s2331_s2 = inlined_call_operand.hbm [shape: bf16[2,2,256,256], index: 2, kind: input, shape index: {}]   ;;  %s2332_s3 = inlined_call_operand.vmem [shape: f32[256,8], index: 3, kind: input, shape index: {}]   ;;  %s2333_s4 = inlined_call_operand.vmem [shape: bf16[8,256], index: 4, kind: input, shape index: {}]   ;;  %s2334_s5 = inlined_call_operand.<no memory space> [shape: f32[1], index: 5, kind: input, shape index: {}]   ;;  %s2335_s6 = inlined_call_operand.hbm [shape: f32[2,8,256], index: 6, kind: output, shape index: {}]  }
   0x1   :  { %2340 = sst [smem:[#allocation18_spill]] %s2331_s2 }
   0x2   :  { %11 = sst [smem:[#allocation4]] %s2334_s5 }
   0x3   :  { %12 = vsyncpa [#allocation6], 0 }
   0x4   :  { %14 = vsyncpa [#allocation6 + $0x1], 0 }
   0x5   :  { %15 = vsyncpa [#allocation7], 0 }
   0x6   :  { %17 = vsyncpa [#allocation7 + $0x1], 0  ;;  %s1936_s23 = smov 0   ;;  %s1938_s24 = smov 0  }
   0x7   :  { %s1940_s25 = smov 0   ;;  %s1942_s26 = smov 0  }
   0x8   :  { %s1944_s27 = smov 0   ;;  %s1946_s28 = smov 0  }
   0x9   :  { %s1948_s29 = smov 0   ;;  %s1950_s30 = smov 0  }
   0xa LB: > { %2341 = sst [smem:[#allocation14_spill]] %s1880_s28  ;;  %s1521_s5 = sadd.s32 4294967295, %s1888_s30   ;;  %s1888_s30 = sphi %s1950_s30, %s23_s30   ;;  %s1884_s29 = sphi %s1948_s29, %s2353_s29   ;;  %s1880_s28 = sphi %s1946_s28, %s2352_s28   ;;  %s1876_s27 = sphi %s1944_s27, %s2351_s27   ;;  %s1872_s26 = sphi %s1942_s26, %s2350_s26   ;;  %s1868_s25 = sphi %s1940_s25, %s2356_s25   ;;  %s1864_s24 = sphi %s1938_s24, %s2355_s24   ;;  %s1860_s23 = sphi %s1936_s23, %s2354_s23  }
   0xb   : > { %2342 = sst [smem:[#allocation15_spill]] %s1884_s29  ;;  %s1522_s7 = sadd.s32 4294967294, %s1888_s30  }
   0xc   : > { %s35_s8 = sadd.s32 1, %s1880_s28  ;;  %s42_s9 = sadd.s32 1, %s1884_s29 }
   0xd   : > { %p36_p0 = scmp.ge.s32.totalorder %s35_s8, 2  ;;  %p120_p1 = scmp.ne.s32.totalorder %s1868_s25, %s1864_s24 }
   0xe   : > { %p121_p2 = scmp.eq.s32.totalorder %s1888_s30, 0  ;;  %p126_p5 = scmp.ne.s32.totalorder %s1864_s24, %s1860_s23 }
   0xf   : > { %s2358_s8 = smov (%p36_p0, %s35_s8), 0  ;;  %s2360_s9 = smov (!%p36_p0, %s42_s9), %s1884_s29 }
  0x10   : > { %2343 = sst [smem:[#allocation16_spill]] %s2358_s8  ;;  %s109_s10 = ssub.s32 %s1880_s28, %s2358_s8 }
  0x11   : > { %p1988_p3 = por %p121_p2, %p120_p1  ;;  %p44_p4 = scmp.ge.s32.totalorder %s2360_s9, 2 }
  0x12   : > { %p127_p6 = scmp.eq.s32.totalorder %s1521_s5, 0  ;;  %p219_p7 = scmp.eq.s32.totalorder %s1521_s5, 3 }
  0x13   : > { %s2362_s9 = smov (%p44_p4, %s2360_s9), 0  ;;  %p225_p10 = scmp.eq.s32.totalorder %s1522_s7, 3 }
  0x14   : > { %2345 = sst [smem:[#allocation17_spill]] %s2362_s9  ;;  %p1996_p8 = por %p127_p6, %p126_p5 }
  0x15   : > { %p2000_p9 = por %p219_p7, %p120_p1  ;;  %s108_s14 = ssub.s32 %s1884_s29, %s2362_s9 }
  0x16   : > { %s110_s15 = sor.u32 %s109_s10, %s108_s14  ;;  %s113_s16 = sadd.s32 1, %s1868_s25 }
  0x17   : > { %p111_p11 = scmp.eq.s32.totalorder %s110_s15, 0  ;;  %p2007_p12 = por %p225_p10, %p126_p5 }
  0x18   : > { %p1524_p13 = scmp.ge.s32.totalorder %s1888_s30, 4 }
  0x19   : > { %s2012_s18 = scalar_select %p111_p11, %s1868_s25, %s113_s16  }
  0x1a   : > { %250 = sbr.rel (%p1524_p13) target bundleno = 49 (0x31), region = 28 }
  0x21   : > { %s277_s19 = sand.u32 1, %s1868_s25   ;;  %s1627_s20 = sshll.u32 %s1880_s28, 5 }
  0x22   : > { %s1525_s21 = sshll.u32 %s277_s19, 8  ;;  %s1528_s22 = sshll.u32 %s1884_s29, 7 }
  0x23   : > { %s290_s5 = sadd.s32 %s1627_s20, %s1528_s22  ;;  %s281_s7 = scalar_lea.vmem [#allocation5], %s1525_s21 }
  0x24   : > { %s305_s10 = sshll.u32 %s281_s7, 4  ;;  %s1529_s14 = sshll.u32 %s290_s5, 6  ;;  %s306_s10 = int_to_ptr.vmem [resolvable:$true] %s305_s10 }
  0x25   : > { %s1653_s15 = scalar_select %p1988_p3, [#allocation0], [#allocation11] }
  0x26   : > { %s1890_s16 = smov 4096   ;;  %s1891_s8 = smov 2048  }
  0x27   : > { %1654 = sst [smem:[#allocation10]] (%p1988_p3), %s1890_s16  ;;  %s1892_s28 = smov 16  }
  0x28   : > { %s297_s9 = sld [smem:[%s1653_s15]]   ;;  %s1893_s20 = smov 128  }
  0x29   : > { %1655 = sst [smem:[#allocation10 + $0x1]] (%p1988_p3), %s1891_s8  ;;  %s2349_s2 = sld [smem:[#allocation18_spill]] }
  0x2a   : > { %1656 = sst [smem:[#allocation10 + $0x2]] (%p1988_p3), %s1892_s28  ;;  %s1894_s7 = smov 8  }
  0x2b   : > { %1657 = sst [smem:[#allocation10 + $0x3]] (%p1988_p3), %s1893_s20  ;;  %s278_s29 = scalar_lea.sflag [#allocation6], %s277_s19 }
  0x2c   : > { %1658 = sst [smem:[#allocation10 + $0x4]] (%p1988_p3), %s1893_s20  ;;  %s1895_s8 = smov [#allocation9]  }
  0x2d   : > { %1659 = sst [smem:[#allocation10 + $0x5]] (%p1988_p3), %s1894_s7 }
  0x2e   : > { %s1530_s15 = sshll.u32 %s297_s9, 26 }
  0x2f   : > { %s292_s5 = scalar_lea.hbm %s2349_s2, %s1529_s14  ;;  %s1531_s16 = sadd.s32 134217728, %s1530_s15 }
  0x30   : > { %1660 = dma.general (%p1988_p3), %s292_s5, 4096, %s306_s10, %s278_s29, %s1895_s8, [#allocation10], %s1531_s16, 0  }
  0x31 PF: > { %p1532_p0 = scmp.ge.s32.totalorder %s1888_s30, 1  ;;  %p326_p1 = scmp.lt.s32.totalorder %s1888_s30, 5 }
  0x33   : > { %p327_p2 = pnand %p1532_p0, %p326_p1 }
  0x34   : > { %s2040_s28 = sand.u32 (!%p327_p2), 1, %s1864_s24  }
  0x35   : > { %330 = sbr.rel (%p327_p2) target bundleno = 923 (0x39b), region = 44  ;;  %s1533_s14 = sshll.u32 (!%p327_p2), %s2040_s28, 8 }
  0x36   : > { %s333_s9 = scalar_lea.sflag (!%p327_p2), [#allocation6], %s2040_s28  ;;  %s2044_s20 = scalar_lea.vmem (!%p327_p2), [#allocation5], %s1533_s14 }
  0x3c   : > { %1851 = dma.done.wait (%p1996_p8), %s333_s9, 4096  }
  0x3d   : > { %1853 = vsyncadd (%p1996_p8), %s333_s9, 4294963200  ;;  %s1534_s29 = sshll.u32 %s2040_s28, 3  ;;  %p380_p3 = scmp.lt.s32.totalorder %s1876_s27, 1 }
  0x3e   : > { %p389_p4 = scmp.lt.s32.totalorder %s1872_s26, 1  ;;  %s2063_s9 = scalar_lea.vmem [#allocation8], %s1534_s29 }
  0x3f   : > { %s381_s11 = scalar_select %p380_p3, %s1876_s27, 1 }
  0x40   : > { %s390_s19 = scalar_select %p389_p4, %s1872_s26, 1 }
  0x41   : > { %s1628_s10 = sshll.u32 %s381_s11, 4  ;;  %s1537_s21 = sshll.u32 %s381_s11, 1 }
  0x42   : > { %s384_s7 = scalar_lea.vmem %s2329_s0, %s1628_s10  ;;  %s392_s15 = sadd.s32 %s1537_s21, %s390_s19 }
  0x43   : > { %s1538_s16 = sshll.u32 %s392_s15, 3  ;;  %p1539_p5 = scmp.ne.s32.totalorder %s1872_s26, 0 }
  0x44   : > { %s2061_s14 = scalar_lea.vmem %s2330_s1, %s1538_s16  ;;  %v440_v0 = vld [vmem:[%s384_s7 + $0x8] sm:$0xff] (!%p1539_p5)  ;;  %v439_v1 = vld [vmem:[%s384_s7] sm:$0xff] (!%p1539_p5)  ;;  %vm441_vm0 = vcmask (!%p1539_p5), 64512   ;;  %v1896_v4 = vmov (!%p1539_p5), 0.0   ;;  %v409_v7 = vld [vmem:[%s2332_s3 + $0x10] sm:$0xff] (!%p1539_p5) }
  0x45   : > { %406 = sbr.rel (%p1539_p5) target bundleno = 348 (0x15c), region = 52  ;;  %538 = vmatprep.subr.mxu0 (!%p1539_p5), %v440_v0  ;;  %1651 = vmatprep.subr.mxu1 (!%p1539_p5), %v440_v0  ;;  %v407_v2 = vld [vmem:[%s2332_s3] sm:$0xff] (!%p1539_p5)  ;;  %v408_v5 = vld [vmem:[%s2332_s3 + $0x8] sm:$0xff] (!%p1539_p5)  ;;  %v425_v8 = vld [vmem:[%s2332_s3 + $0x90] sm:$0xff] (!%p1539_p5) }
  0x46   : > { %v423_v3 = vld [vmem:[%s2332_s3 + $0x80] sm:$0xff] (!%p1539_p5)  ;;  %539 = vmatpush1.msra.mxu0 (!%p1539_p5), %v439_v1  ;;  %1652 = vmatpush1.msra.mxu1 (!%p1539_p5), %v439_v1  ;;  %v424_v6 = vld [vmem:[%s2332_s3 + $0x88] sm:$0xff] (!%p1539_p5)  ;;  %v410_v9 = vld [vmem:[%s2332_s3 + $0x18] sm:$0xff] (!%p1539_p5) }
  0x47   : > { %602 = vmatprep.mubr.f32.mxu0 (!%p1539_p5), %v1896_v4  ;;  %698 = vmatprep.mubr.f32.mxu1 (!%p1539_p5), %v1896_v4  ;;  %v426_v10 = vld [vmem:[%s2332_s3 + $0x98] sm:$0xff] (!%p1539_p5)  ;;  %v411_v11 = vld [vmem:[%s2332_s3 + $0x20] sm:$0xff] (!%p1539_p5)  ;;  %v412_v13 = vld [vmem:[%s2332_s3 + $0x28] sm:$0xff] (!%p1539_p5) }
  0x48   : > { %1540 = vmatmul.mubr.msk.f32.vlgmr.msra.gmra.mrb[0].mxu0 (!%p1539_p5), %vm441_vm0, %v407_v2  ;;  %1556 = vmatmul.mubr.msk.f32.vlgmr.msra.gmra.mrb[0].mxu1 (!%p1539_p5), %vm441_vm0, %v423_v3  ;;  %v427_v12 = vld [vmem:[%s2332_s3 + $0xa0] sm:$0xff] (!%p1539_p5)  ;;  %v428_v14 = vld [vmem:[%s2332_s3 + $0xa8] sm:$0xff] (!%p1539_p5)  ;;  %v413_v15 = vld [vmem:[%s2332_s3 + $0x30] sm:$0xff] (!%p1539_p5) }
  0x49   : > { %608 = vmatprep.mubr.f32.mxu0 (!%p1539_p5), %v1896_v4  ;;  %704 = vmatprep.mubr.f32.mxu1 (!%p1539_p5), %v1896_v4  ;;  %v429_v16 = vld [vmem:[%s2332_s3 + $0xb0] sm:$0xff] (!%p1539_p5)  ;;  %v414_v17 = vld [vmem:[%s2332_s3 + $0x38] sm:$0xff] (!%p1539_p5)  ;;  %v415_v19 = vld [vmem:[%s2332_s3 + $0x40] sm:$0xff] (!%p1539_p5) }
  0x4a   : > { %v430_v18 = vld [vmem:[%s2332_s3 + $0xb8] sm:$0xff] (!%p1539_p5)  ;;  %v431_v20 = vld [vmem:[%s2332_s3 + $0xc0] sm:$0xff] (!%p1539_p5)  ;;  %v416_v21 = vld [vmem:[%s2332_s3 + $0x48] sm:$0xff] (!%p1539_p5) }
  0x4b   : > { %v432_v22 = vld [vmem:[%s2332_s3 + $0xc8] sm:$0xff] (!%p1539_p5)  ;;  %v417_v23 = vld [vmem:[%s2332_s3 + $0x50] sm:$0xff] (!%p1539_p5)  ;;  %v418_v25 = vld [vmem:[%s2332_s3 + $0x58] sm:$0xff] (!%p1539_p5) }
  0x4c   : > { %1541 = vmatmul.mubr.msk.f32.gmra.mrb[2].mxu0 %vm441_vm0, %v408_v5  ;;  %1557 = vmatmul.mubr.msk.f32.gmra.mrb[2].mxu1 %vm441_vm0, %v424_v6  ;;  %v433_v24 = vld [vmem:[%s2332_s3 + $0xd0] sm:$0xff]  ;;  %v434_v26 = vld [vmem:[%s2332_s3 + $0xd8] sm:$0xff]  ;;  %v419_v27 = vld [vmem:[%s2332_s3 + $0x60] sm:$0xff] }
  0x4d   : > { %614 = vmatprep.mubr.f32.mxu0 %v1896_v4  ;;  %710 = vmatprep.mubr.f32.mxu1 %v1896_v4  ;;  %v435_v28 = vld [vmem:[%s2332_s3 + $0xe0] sm:$0xff]  ;;  %v420_v29 = vld [vmem:[%s2332_s3 + $0x68] sm:$0xff]  ;;  %v421_v31 = vld [vmem:[%s2332_s3 + $0x70] sm:$0xff] }
  0x4e   : > { %v436_v30 = vld [vmem:[%s2332_s3 + $0xe8] sm:$0xff]  ;;  %v437_v32 = vld [vmem:[%s2332_s3 + $0xf0] sm:$0xff]  ;;  %v422_v33 = vld [vmem:[%s2332_s3 + $0x78] sm:$0xff] }
  0x4f   : > { %v438_v34 = vld [vmem:[%s2332_s3 + $0xf8] sm:$0xff] }
  0x50   : > { %1542 = vmatmul.mubr.msk.f32.gmra.mrb[4].mxu0 %vm441_vm0, %v409_v7  ;;  %1558 = vmatmul.mubr.msk.f32.gmra.mrb[4].mxu1 %vm441_vm0, %v425_v8 }
  0x51   : > { %620 = vmatprep.mubr.f32.mxu0 %v1896_v4  ;;  %716 = vmatprep.mubr.f32.mxu1 %v1896_v4 }
  0x54   : > { %1543 = vmatmul.mubr.msk.f32.gmra.mrb[6].mxu0 %vm441_vm0, %v410_v9  ;;  %1559 = vmatmul.mubr.msk.f32.gmra.mrb[6].mxu1 %vm441_vm0, %v426_v10 }
  0x55   : > { %626 = vmatprep.mubr.f32.mxu0 %v1896_v4  ;;  %722 = vmatprep.mubr.f32.mxu1 %v1896_v4 }
  0x58   : > { %1544 = vmatmul.mubr.msk.f32.gmra.mrb[8].mxu0 %vm441_vm0, %v411_v11  ;;  %1560 = vmatmul.mubr.msk.f32.gmra.mrb[8].mxu1 %vm441_vm0, %v427_v12 }
  0x59   : > { %632 = vmatprep.mubr.f32.mxu0 %v1896_v4  ;;  %728 = vmatprep.mubr.f32.mxu1 %v1896_v4 }
  0x5c   : > { %1545 = vmatmul.mubr.msk.f32.gmra.mrb[10].mxu0 %vm441_vm0, %v412_v13  ;;  %1561 = vmatmul.mubr.msk.f32.gmra.mrb[10].mxu1 %vm441_vm0, %v428_v14 }
  0x5d   : > { %638 = vmatprep.mubr.f32.mxu0 %v1896_v4  ;;  %734 = vmatprep.mubr.f32.mxu1 %v1896_v4 }
  0x60   : > { %1546 = vmatmul.mubr.msk.f32.gmra.mrb[12].mxu0 %vm441_vm0, %v413_v15  ;;  %1562 = vmatmul.mubr.msk.f32.gmra.mrb[12].mxu1 %vm441_vm0, %v429_v16 }
  0x61   : > { %644 = vmatprep.mubr.f32.mxu0 %v1896_v4  ;;  %740 = vmatprep.mubr.f32.mxu1 %v1896_v4 }
  0x64   : > { %1547 = vmatmul.mubr.msk.f32.gmra.mrb[14].mxu0 %vm441_vm0, %v414_v17  ;;  %1563 = vmatmul.mubr.msk.f32.gmra.mrb[14].mxu1 %vm441_vm0, %v430_v18 }
  0x65   : > { %650 = vmatprep.mubr.f32.mxu0 %v1896_v4  ;;  %746 = vmatprep.mubr.f32.mxu1 %v1896_v4 }
  0x68   : > { %1548 = vmatmul.mubr.msk.f32.gmra.mrb[16].mxu0 %vm441_vm0, %v415_v19  ;;  %1564 = vmatmul.mubr.msk.f32.gmra.mrb[16].mxu1 %vm441_vm0, %v431_v20 }
  0x69   : > { %656 = vmatprep.mubr.f32.mxu0 %v1896_v4  ;;  %752 = vmatprep.mubr.f32.mxu1 %v1896_v4 }
  0x6c   : > { %1549 = vmatmul.mubr.msk.f32.gmra.mrb[18].mxu0 %vm441_vm0, %v416_v21  ;;  %1565 = vmatmul.mubr.msk.f32.gmra.mrb[18].mxu1 %vm441_vm0, %v432_v22 }
  0x6d   : > { %662 = vmatprep.mubr.f32.mxu0 %v1896_v4  ;;  %758 = vmatprep.mubr.f32.mxu1 %v1896_v4 }
  0x70   : > { %1550 = vmatmul.mubr.msk.f32.gmra.mrb[20].mxu0 %vm441_vm0, %v417_v23  ;;  %1566 = vmatmul.mubr.msk.f32.gmra.mrb[20].mxu1 %vm441_vm0, %v433_v24 }
  0x71   : > { %668 = vmatprep.mubr.f32.mxu0 %v1896_v4  ;;  %764 = vmatprep.mubr.f32.mxu1 %v1896_v4 }
  0x74   : > { %1551 = vmatmul.mubr.msk.f32.gmra.mrb[22].mxu0 %vm441_vm0, %v418_v25  ;;  %1567 = vmatmul.mubr.msk.f32.gmra.mrb[22].mxu1 %vm441_vm0, %v434_v26 }
  0x75   : > { %674 = vmatprep.mubr.f32.mxu0 %v1896_v4  ;;  %770 = vmatprep.mubr.f32.mxu1 %v1896_v4 }
  0x78   : > { %1552 = vmatmul.mubr.msk.f32.gmra.mrb[24].mxu0 %vm441_vm0, %v419_v27  ;;  %1568 = vmatmul.mubr.msk.f32.gmra.mrb[24].mxu1 %vm441_vm0, %v435_v28 }
  0x79   : > { %680 = vmatprep.mubr.f32.mxu0 %v1896_v4  ;;  %776 = vmatprep.mubr.f32.mxu1 %v1896_v4 }
  0x7c   : > { %1553 = vmatmul.mubr.msk.f32.gmra.mrb[26].mxu0 %vm441_vm0, %v420_v29  ;;  %1569 = vmatmul.mubr.msk.f32.gmra.mrb[26].mxu1 %vm441_vm0, %v436_v30 }
  0x7d   : > { %686 = vmatprep.mubr.f32.mxu0 %v1896_v4  ;;  %782 = vmatprep.mubr.f32.mxu1 %v1896_v4 }
  0x80   : > { %1554 = vmatmul.mubr.msk.f32.gmra.mrb[28].mxu0 %vm441_vm0, %v421_v31  ;;  %1570 = vmatmul.mubr.msk.f32.gmra.mrb[28].mxu1 %vm441_vm0, %v437_v32 }
  0x81   : > { %692 = vmatprep.mubr.f32.mxu0 %v1896_v4  ;;  %788 = vmatprep.mubr.f32.mxu1 %v1896_v4 }
  0x84   : > { %1555 = vmatmul.mubr.msk.f32.gmra.mrb[30].mxu0 %vm441_vm0, %v422_v33  ;;  %1571 = vmatmul.mubr.msk.f32.gmra.mrb[30].mxu1 %vm441_vm0, %v438_v34 }
 0x11b   : > { %v604_v35 = vpop.f32.mrb[0].mxu0  ;;  %v700_v36 = vpop.f32.mrb[0].mxu1 }
 0x11c   : > { %v606_v37 = vpop.f32.mrb[1].mxu0  ;;  %v702_v38 = vpop.f32.mrb[1].mxu1 }
 0x11f   : > { %v610_v39 = vpop.f32.mrb[2].mxu0  ;;  %v706_v40 = vpop.f32.mrb[2].mxu1 }
 0x120   : > { %v795_v41 = vpack.c.bf16 %v610_v39, %v604_v35  ;;  %v811_v42 = vpack.c.bf16 %v706_v40, %v700_v36  ;;  %v612_v43 = vpop.f32.mrb[3].mxu0  ;;  %v708_v44 = vpop.f32.mrb[3].mxu1 }
 0x121   : > { %v796_v45 = vpack.c.bf16 %v612_v43, %v606_v37  ;;  %v812_v46 = vpack.c.bf16 %v708_v44, %v702_v38 }
 0x122   : > { %827 = vst [vmem:[#allocation2] sm:$0xff] %v795_v41  ;;  %843 = vst [vmem:[#allocation2 + $0x80] sm:$0xff] %v811_v42 }
 0x123   : > { %828 = vst [vmem:[#allocation2 + $0x8] sm:$0xff] %v796_v45  ;;  %844 = vst [vmem:[#allocation2 + $0x88] sm:$0xff] %v812_v46  ;;  %v616_v47 = vpop.f32.mrb[4].mxu0  ;;  %v712_v48 = vpop.f32.mrb[4].mxu1 }
 0x124   : > { %v618_v49 = vpop.f32.mrb[5].mxu0  ;;  %v714_v50 = vpop.f32.mrb[5].mxu1 }
 0x127   : > { %v622_v51 = vpop.f32.mrb[6].mxu0  ;;  %v718_v52 = vpop.f32.mrb[6].mxu1 }
 0x128   : > { %v797_v53 = vpack.c.bf16 %v622_v51, %v616_v47  ;;  %v813_v54 = vpack.c.bf16 %v718_v52, %v712_v48  ;;  %v624_v55 = vpop.f32.mrb[7].mxu0  ;;  %v720_v56 = vpop.f32.mrb[7].mxu1 }
 0x129   : > { %v798_v57 = vpack.c.bf16 %v624_v55, %v618_v49  ;;  %v814_v58 = vpack.c.bf16 %v720_v56, %v714_v50 }
 0x12a   : > { %829 = vst [vmem:[#allocation2 + $0x10] sm:$0xff] %v797_v53  ;;  %845 = vst [vmem:[#allocation2 + $0x90] sm:$0xff] %v813_v54 }
 0x12b   : > { %830 = vst [vmem:[#allocation2 + $0x18] sm:$0xff] %v798_v57  ;;  %846 = vst [vmem:[#allocation2 + $0x98] sm:$0xff] %v814_v58  ;;  %v628_v59 = vpop.f32.mrb[8].mxu0  ;;  %v724_v60 = vpop.f32.mrb[8].mxu1 }
 0x12c   : > { %v630_v61 = vpop.f32.mrb[9].mxu0  ;;  %v726_v62 = vpop.f32.mrb[9].mxu1 }
 0x12f   : > { %v634_v63 = vpop.f32.mrb[10].mxu0  ;;  %v730_v0 = vpop.f32.mrb[10].mxu1 }
 0x130   : > { %v799_v1 = vpack.c.bf16 %v634_v63, %v628_v59  ;;  %v815_v2 = vpack.c.bf16 %v730_v0, %v724_v60  ;;  %v636_v3 = vpop.f32.mrb[11].mxu0  ;;  %v732_v4 = vpop.f32.mrb[11].mxu1 }
 0x131   : > { %v800_v5 = vpack.c.bf16 %v636_v3, %v630_v61  ;;  %v816_v6 = vpack.c.bf16 %v732_v4, %v726_v62 }
 0x132   : > { %831 = vst [vmem:[#allocation2 + $0x20] sm:$0xff] %v799_v1  ;;  %847 = vst [vmem:[#allocation2 + $0xa0] sm:$0xff] %v815_v2 }
 0x133   : > { %832 = vst [vmem:[#allocation2 + $0x28] sm:$0xff] %v800_v5  ;;  %848 = vst [vmem:[#allocation2 + $0xa8] sm:$0xff] %v816_v6  ;;  %v640_v7 = vpop.f32.mrb[12].mxu0  ;;  %v736_v8 = vpop.f32.mrb[12].mxu1 }
 0x134   : > { %v642_v9 = vpop.f32.mrb[13].mxu0  ;;  %v738_v10 = vpop.f32.mrb[13].mxu1 }
 0x137   : > { %v646_v11 = vpop.f32.mrb[14].mxu0  ;;  %v742_v12 = vpop.f32.mrb[14].mxu1 }
 0x138   : > { %v801_v13 = vpack.c.bf16 %v646_v11, %v640_v7  ;;  %v817_v14 = vpack.c.bf16 %v742_v12, %v736_v8  ;;  %v648_v15 = vpop.f32.mrb[15].mxu0  ;;  %v744_v16 = vpop.f32.mrb[15].mxu1 }
 0x139   : > { %v802_v17 = vpack.c.bf16 %v648_v15, %v642_v9  ;;  %v818_v18 = vpack.c.bf16 %v744_v16, %v738_v10 }
 0x13a   : > { %833 = vst [vmem:[#allocation2 + $0x30] sm:$0xff] %v801_v13  ;;  %849 = vst [vmem:[#allocation2 + $0xb0] sm:$0xff] %v817_v14 }
 0x13b   : > { %834 = vst [vmem:[#allocation2 + $0x38] sm:$0xff] %v802_v17  ;;  %850 = vst [vmem:[#allocation2 + $0xb8] sm:$0xff] %v818_v18  ;;  %v652_v19 = vpop.f32.mrb[16].mxu0  ;;  %v748_v20 = vpop.f32.mrb[16].mxu1 }
 0x13c   : > { %v654_v21 = vpop.f32.mrb[17].mxu0  ;;  %v750_v22 = vpop.f32.mrb[17].mxu1 }
 0x13f   : > { %v658_v23 = vpop.f32.mrb[18].mxu0  ;;  %v754_v24 = vpop.f32.mrb[18].mxu1 }
 0x140   : > { %v803_v25 = vpack.c.bf16 %v658_v23, %v652_v19  ;;  %v819_v26 = vpack.c.bf16 %v754_v24, %v748_v20  ;;  %v660_v27 = vpop.f32.mrb[19].mxu0  ;;  %v756_v28 = vpop.f32.mrb[19].mxu1 }
 0x141   : > { %v804_v29 = vpack.c.bf16 %v660_v27, %v654_v21  ;;  %v820_v30 = vpack.c.bf16 %v756_v28, %v750_v22 }
 0x142   : > { %835 = vst [vmem:[#allocation2 + $0x40] sm:$0xff] %v803_v25  ;;  %851 = vst [vmem:[#allocation2 + $0xc0] sm:$0xff] %v819_v26 }
 0x143   : > { %836 = vst [vmem:[#allocation2 + $0x48] sm:$0xff] %v804_v29  ;;  %852 = vst [vmem:[#allocation2 + $0xc8] sm:$0xff] %v820_v30  ;;  %v664_v31 = vpop.f32.mrb[20].mxu0  ;;  %v760_v32 = vpop.f32.mrb[20].mxu1 }
 0x144   : > { %v666_v33 = vpop.f32.mrb[21].mxu0  ;;  %v762_v34 = vpop.f32.mrb[21].mxu1 }
 0x147   : > { %v670_v35 = vpop.f32.mrb[22].mxu0  ;;  %v766_v36 = vpop.f32.mrb[22].mxu1 }
 0x148   : > { %v805_v37 = vpack.c.bf16 %v670_v35, %v664_v31  ;;  %v821_v38 = vpack.c.bf16 %v766_v36, %v760_v32  ;;  %v672_v39 = vpop.f32.mrb[23].mxu0  ;;  %v768_v40 = vpop.f32.mrb[23].mxu1 }
 0x149   : > { %v806_v41 = vpack.c.bf16 %v672_v39, %v666_v33  ;;  %v822_v42 = vpack.c.bf16 %v768_v40, %v762_v34 }
 0x14a   : > { %837 = vst [vmem:[#allocation2 + $0x50] sm:$0xff] %v805_v37  ;;  %853 = vst [vmem:[#allocation2 + $0xd0] sm:$0xff] %v821_v38 }
 0x14b   : > { %838 = vst [vmem:[#allocation2 + $0x58] sm:$0xff] %v806_v41  ;;  %854 = vst [vmem:[#allocation2 + $0xd8] sm:$0xff] %v822_v42  ;;  %v676_v43 = vpop.f32.mrb[24].mxu0  ;;  %v772_v44 = vpop.f32.mrb[24].mxu1 }
 0x14c   : > { %v678_v45 = vpop.f32.mrb[25].mxu0  ;;  %v774_v46 = vpop.f32.mrb[25].mxu1 }
 0x14f   : > { %v682_v47 = vpop.f32.mrb[26].mxu0  ;;  %v778_v48 = vpop.f32.mrb[26].mxu1 }
 0x150   : > { %v807_v49 = vpack.c.bf16 %v682_v47, %v676_v43  ;;  %v823_v50 = vpack.c.bf16 %v778_v48, %v772_v44  ;;  %v684_v51 = vpop.f32.mrb[27].mxu0  ;;  %v780_v52 = vpop.f32.mrb[27].mxu1 }
 0x151   : > { %v808_v53 = vpack.c.bf16 %v684_v51, %v678_v45  ;;  %v824_v54 = vpack.c.bf16 %v780_v52, %v774_v46 }
 0x152   : > { %839 = vst [vmem:[#allocation2 + $0x60] sm:$0xff] %v807_v49  ;;  %855 = vst [vmem:[#allocation2 + $0xe0] sm:$0xff] %v823_v50 }
 0x153   : > { %840 = vst [vmem:[#allocation2 + $0x68] sm:$0xff] %v808_v53  ;;  %856 = vst [vmem:[#allocation2 + $0xe8] sm:$0xff] %v824_v54  ;;  %v688_v55 = vpop.f32.mrb[28].mxu0  ;;  %v784_v56 = vpop.f32.mrb[28].mxu1 }
 0x154   : > { %v690_v57 = vpop.f32.mrb[29].mxu0  ;;  %v786_v58 = vpop.f32.mrb[29].mxu1 }
 0x157   : > { %v694_v59 = vpop.f32.mrb[30].mxu0  ;;  %v790_v60 = vpop.f32.mrb[30].mxu1 }
 0x158   : > { %v809_v61 = vpack.c.bf16 %v694_v59, %v688_v55  ;;  %v825_v62 = vpack.c.bf16 %v790_v60, %v784_v56  ;;  %v696_v63 = vpop.f32.mrb[31].mxu0  ;;  %v792_v0 = vpop.f32.mrb[31].mxu1 }
 0x159   : > { %v810_v1 = vpack.c.bf16 %v696_v63, %v690_v57  ;;  %v826_v2 = vpack.c.bf16 %v792_v0, %v786_v58 }
 0x15a   : > { %841 = vst [vmem:[#allocation2 + $0x70] sm:$0xff] %v809_v61  ;;  %857 = vst [vmem:[#allocation2 + $0xf0] sm:$0xff] %v825_v62 }
 0x15b   : > { %842 = vst [vmem:[#allocation2 + $0x78] sm:$0xff] %v810_v1  ;;  %858 = vst [vmem:[#allocation2 + $0xf8] sm:$0xff] %v826_v2 }
 0x15c PF: > { %v1740_v3 = vld [vmem:[%s2044_s20 + $0x4] ss:$8 sps:$4 sm:$0xff]   ;;  %v1744_v5 = vld [vmem:[%s2044_s20] ss:$8 sps:$4 sm:$0xff]   ;;  %v1746_v7 = vld [vmem:[%s2044_s20 + $0x14] ss:$8 sps:$4 sm:$0xff]  }
 0x15d   : > { %v1742_v4 = vld [vmem:[%s2044_s20 + $0x84] ss:$8 sps:$4 sm:$0xff]   ;;  %972 = vmatprep.subr.bf16.mxu0 %v1740_v3  ;;  %v1745_v6 = vld [vmem:[%s2044_s20 + $0x80] ss:$8 sps:$4 sm:$0xff]   ;;  %v1748_v8 = vld [vmem:[%s2044_s20 + $0x94] ss:$8 sps:$4 sm:$0xff]  }
 0x15e   : > { %1198 = vmatprep.subr.bf16.mxu1 %v1742_v4  ;;  %973 = vmatpush1.bf16.xpose.msra.mxu0 %v1744_v5  ;;  %v1750_v9 = vld [vmem:[%s2044_s20 + $0x10] ss:$8 sps:$4 sm:$0xff]   ;;  %v1752_v11 = vld [vmem:[%s2044_s20 + $0x24] ss:$8 sps:$4 sm:$0xff]   ;;  %v1756_v13 = vld [vmem:[%s2044_s20 + $0x20] ss:$8 sps:$4 sm:$0xff]  }
 0x15f   : > { %1199 = vmatpush1.bf16.xpose.msra.mxu1 %v1745_v6  ;;  %974 = vmatprep.subr.bf16.mxu0 %v1746_v7  ;;  %v1751_v10 = vld [vmem:[%s2044_s20 + $0x90] ss:$8 sps:$4 sm:$0xff]   ;;  %v1754_v12 = vld [vmem:[%s2044_s20 + $0xa4] ss:$8 sps:$4 sm:$0xff]   ;;  %v1757_v14 = vld [vmem:[%s2044_s20 + $0xa0] ss:$8 sps:$4 sm:$0xff]  }
 0x160   : > { %1200 = vmatprep.subr.bf16.mxu1 %v1748_v8  ;;  %v1758_v15 = vld [vmem:[%s2044_s20 + $0x34] ss:$8 sps:$4 sm:$0xff]   ;;  %v861_v17 = vld [vmem:[#allocation2 + $0x8] sm:$0xff]  ;;  %v1762_v19 = vld [vmem:[%s2044_s20 + $0x30] ss:$8 sps:$4 sm:$0xff]   ;;  %s859_s8 = sld [smem:[#allocation4]] }
 0x161   : > { %v1760_v16 = vld [vmem:[%s2044_s20 + $0xb4] ss:$8 sps:$4 sm:$0xff]   ;;  %v1086_v18 = vld [vmem:[#allocation2 + $0x88] sm:$0xff]  ;;  %1004 = vmatprep.mubr.bf16.mxu0 %v861_v17  ;;  %v1763_v20 = vld [vmem:[%s2044_s20 + $0xb0] ss:$8 sps:$4 sm:$0xff]   ;;  %s1623_s11 = sshll.u32 %s1876_s27, 1 }
 0x162   : > { %1230 = vmatprep.mubr.bf16.mxu1 %v1086_v18  ;;  %v1764_v21 = vld [vmem:[%s2044_s20 + $0x44] ss:$8 sps:$4 sm:$0xff]   ;;  %v1768_v23 = vld [vmem:[%s2044_s20 + $0x40] ss:$8 sps:$4 sm:$0xff]   ;;  %v1770_v25 = vld [vmem:[%s2044_s20 + $0x54] ss:$8 sps:$4 sm:$0xff]   ;;  %s1394_s19 = sadd.s32 %s1872_s26, %s1623_s11 }
 0x163   : > { %v1766_v22 = vld [vmem:[%s2044_s20 + $0xc4] ss:$8 sps:$4 sm:$0xff]   ;;  %v1769_v24 = vld [vmem:[%s2044_s20 + $0xc0] ss:$8 sps:$4 sm:$0xff]   ;;  %v1772_v26 = vld [vmem:[%s2044_s20 + $0xd4] ss:$8 sps:$4 sm:$0xff]  }
 0x164   : > { %v1774_v27 = vld [vmem:[%s2044_s20 + $0x50] ss:$8 sps:$4 sm:$0xff]   ;;  %v1776_v29 = vld [vmem:[%s2044_s20 + $0x64] ss:$8 sps:$4 sm:$0xff]   ;;  %v1780_v31 = vld [vmem:[%s2044_s20 + $0x60] ss:$8 sps:$4 sm:$0xff]  }
 0x165   : > { %v1775_v28 = vld [vmem:[%s2044_s20 + $0xd0] ss:$8 sps:$4 sm:$0xff]   ;;  %v1778_v30 = vld [vmem:[%s2044_s20 + $0xe4] ss:$8 sps:$4 sm:$0xff]   ;;  %v1781_v32 = vld [vmem:[%s2044_s20 + $0xe0] ss:$8 sps:$4 sm:$0xff]  }
 0x166   : > { %975 = vmatpush1.bf16.xpose.msra.mxu0 %v1750_v9  ;;  %v1782_v33 = vld [vmem:[%s2044_s20 + $0x74] ss:$8 sps:$4 sm:$0xff]   ;;  %v1786_v35 = vld [vmem:[%s2044_s20 + $0x70] ss:$8 sps:$4 sm:$0xff]   ;;  %v860_v37 = vld [vmem:[#allocation2] sm:$0xff]  ;;  %s1624_s10 = sshll.u32 %s1394_s19, 7 }
 0x167   : > { %1201 = vmatpush1.bf16.xpose.msra.mxu1 %v1751_v10  ;;  %976 = vmatprep.subr.bf16.mxu0 %v1752_v11  ;;  %v1784_v34 = vld [vmem:[%s2044_s20 + $0xf4] ss:$8 sps:$4 sm:$0xff]   ;;  %v1787_v36 = vld [vmem:[%s2044_s20 + $0xf0] ss:$8 sps:$4 sm:$0xff]   ;;  %v1085_v38 = vld [vmem:[#allocation2 + $0x80] sm:$0xff]  ;;  %s1398_s2 = sshll.u32 %s2063_s9, 4  ;;  %s2274_s22 = scalar_lea.hbm %s2335_s6, %s1624_s10  ;;  %s2276_s2 = int_to_ptr.vmem [resolvable:$true] %s1398_s2 }
 0x168   : > { %1202 = vmatprep.subr.bf16.mxu1 %v1754_v12  ;;  %v863_v39 = vld [vmem:[#allocation2 + $0x18] sm:$0xff]  ;;  %v862_v41 = vld [vmem:[#allocation2 + $0x10] sm:$0xff]  ;;  %v865_v43 = vld [vmem:[#allocation2 + $0x28] sm:$0xff]  ;;  %s1381_s26 = scalar_lea.sflag [#allocation7], %s2040_s28  ;;  %s1790_s27 = scalar_lea.vmem %s2276_s2, 128 }
 0x169   : > { %v1088_v40 = vld [vmem:[#allocation2 + $0x98] sm:$0xff]  ;;  %v1087_v42 = vld [vmem:[#allocation2 + $0x90] sm:$0xff]  ;;  %v1090_v44 = vld [vmem:[#allocation2 + $0xa8] sm:$0xff]  ;;  %p1791_p6 = scmp.ne.s32.totalorder %s2276_s2, %s1790_s27 }
 0x16a   : > { %v864_v45 = vld [vmem:[#allocation2 + $0x20] sm:$0xff]  ;;  %v867_v47 = vld [vmem:[#allocation2 + $0x38] sm:$0xff]  ;;  %v866_v49 = vld [vmem:[#allocation2 + $0x30] sm:$0xff] }
 0x16b   : > { %v1089_v46 = vld [vmem:[#allocation2 + $0xa0] sm:$0xff]  ;;  %v1092_v48 = vld [vmem:[#allocation2 + $0xb8] sm:$0xff]  ;;  %v1091_v50 = vld [vmem:[#allocation2 + $0xb0] sm:$0xff]  ;;  %p1792_p7 = pnand %p1791_p6, %p2000_p9 }
 0x16c   : > { %v869_v51 = vld [vmem:[#allocation2 + $0x48] sm:$0xff]  ;;  %v868_v53 = vld [vmem:[#allocation2 + $0x40] sm:$0xff]  ;;  %v871_v55 = vld [vmem:[#allocation2 + $0x58] sm:$0xff] }
 0x16d   : > { %v1094_v52 = vld [vmem:[#allocation2 + $0xc8] sm:$0xff]  ;;  %v1093_v54 = vld [vmem:[#allocation2 + $0xc0] sm:$0xff]  ;;  %v1096_v56 = vld [vmem:[#allocation2 + $0xd8] sm:$0xff]  ;;  %p1793_p8 = pneg %p1792_p7 }
 0x16e   : > { %977 = vmatpush1.bf16.xpose.msra.mxu0 %v1756_v13  ;;  %v870_v57 = vld [vmem:[#allocation2 + $0x50] sm:$0xff]  ;;  %v873_v59 = vld [vmem:[#allocation2 + $0x68] sm:$0xff]  ;;  %v872_v61 = vld [vmem:[#allocation2 + $0x60] sm:$0xff] }
 0x16f   : > { %1203 = vmatpush1.bf16.xpose.msra.mxu1 %v1757_v14  ;;  %978 = vmatprep.subr.bf16.mxu0 %v1758_v15  ;;  %v1095_v58 = vld [vmem:[#allocation2 + $0xd0] sm:$0xff]  ;;  %v1098_v60 = vld [vmem:[#allocation2 + $0xe8] sm:$0xff]  ;;  %v1097_v62 = vld [vmem:[#allocation2 + $0xe0] sm:$0xff] }
 0x170   : > { %1204 = vmatprep.subr.bf16.mxu1 %v1760_v16  ;;  %v875_v63 = vld [vmem:[#allocation2 + $0x78] sm:$0xff]  ;;  %v874_v1 = vld [vmem:[#allocation2 + $0x70] sm:$0xff]  ;;  %v2261_v3 = vld [vmem:[%s2333_s4] sm:$0xff] }
 0x171   : > { %v1100_v0 = vld [vmem:[#allocation2 + $0xf8] sm:$0xff]  ;;  %v1099_v2 = vld [vmem:[#allocation2 + $0xf0] sm:$0xff]  ;;  %v1621_v4 = vcombine.high %v2261_v3, %v2261_v3 }
 0x176   : > { %979 = vmatpush1.bf16.xpose.msra.mxu0 %v1762_v19 }
 0x177   : > { %1205 = vmatpush1.bf16.xpose.msra.mxu1 %v1763_v20  ;;  %980 = vmatprep.subr.bf16.mxu0 %v1764_v21 }
 0x178   : > { %1206 = vmatprep.subr.bf16.mxu1 %v1766_v22 }
 0x17e   : > { %981 = vmatpush1.bf16.xpose.msra.mxu0 %v1768_v23 }
 0x17f   : > { %1207 = vmatpush1.bf16.xpose.msra.mxu1 %v1769_v24  ;;  %982 = vmatprep.subr.bf16.mxu0 %v1770_v25 }
 0x180   : > { %1208 = vmatprep.subr.bf16.mxu1 %v1772_v26 }
 0x186   : > { %983 = vmatpush1.bf16.xpose.msra.mxu0 %v1774_v27 }
 0x187   : > { %1209 = vmatpush1.bf16.xpose.msra.mxu1 %v1775_v28  ;;  %984 = vmatprep.subr.bf16.mxu0 %v1776_v29 }
 0x188   : > { %1210 = vmatprep.subr.bf16.mxu1 %v1778_v30 }
 0x18e   : > { %985 = vmatpush1.bf16.xpose.msra.mxu0 %v1780_v31 }
 0x18f   : > { %1211 = vmatpush1.bf16.xpose.msra.mxu1 %v1781_v32  ;;  %986 = vmatprep.subr.bf16.mxu0 %v1782_v33 }
 0x190   : > { %1212 = vmatprep.subr.bf16.mxu1 %v1784_v34 }
 0x196   : > { %987 = vmatpush1.bf16.xpose.msra.mxu0 %v1786_v35 }
 0x197   : > { %1213 = vmatpush1.bf16.xpose.msra.mxu1 %v1787_v36 }
 0x19d   : > { %1005 = vmatmul.mubr.bf16.vlgmr.msra.gmra.mrb[0].mxu0 %v860_v37 }
 0x19e   : > { %1231 = vmatmul.mubr.bf16.vlgmr.msra.gmra.mrb[0].mxu1 %v1085_v38  ;;  %1012 = vmatprep.mubr.bf16.mxu0 %v863_v39 }
 0x19f   : > { %1238 = vmatprep.mubr.bf16.mxu1 %v1088_v40 }
 0x1a5   : > { %1013 = vmatmul.mubr.bf16.gmra.mrb[4].mxu0 %v862_v41 }
 0x1a6   : > { %1239 = vmatmul.mubr.bf16.gmra.mrb[4].mxu1 %v1087_v42  ;;  %1020 = vmatprep.mubr.bf16.mxu0 %v865_v43 }
 0x1a7   : > { %1246 = vmatprep.mubr.bf16.mxu1 %v1090_v44 }
 0x1ad   : > { %1021 = vmatmul.mubr.bf16.gmra.mrb[8].mxu0 %v864_v45 }
 0x1ae   : > { %1247 = vmatmul.mubr.bf16.gmra.mrb[8].mxu1 %v1089_v46  ;;  %1028 = vmatprep.mubr.bf16.mxu0 %v867_v47 }
 0x1af   : > { %1254 = vmatprep.mubr.bf16.mxu1 %v1092_v48 }
 0x1b5   : > { %1029 = vmatmul.mubr.bf16.gmra.mrb[12].mxu0 %v866_v49 }
 0x1b6   : > { %1255 = vmatmul.mubr.bf16.gmra.mrb[12].mxu1 %v1091_v50  ;;  %1036 = vmatprep.mubr.bf16.mxu0 %v869_v51 }
 0x1b7   : > { %1262 = vmatprep.mubr.bf16.mxu1 %v1094_v52 }
 0x1bd   : > { %1037 = vmatmul.mubr.bf16.gmra.mrb[16].mxu0 %v868_v53 }
 0x1be   : > { %1263 = vmatmul.mubr.bf16.gmra.mrb[16].mxu1 %v1093_v54  ;;  %1044 = vmatprep.mubr.bf16.mxu0 %v871_v55 }
 0x1bf   : > { %1270 = vmatprep.mubr.bf16.mxu1 %v1096_v56 }
 0x1c5   : > { %1045 = vmatmul.mubr.bf16.gmra.mrb[20].mxu0 %v870_v57 }
 0x1c6   : > { %1271 = vmatmul.mubr.bf16.gmra.mrb[20].mxu1 %v1095_v58  ;;  %1052 = vmatprep.mubr.bf16.mxu0 %v873_v59 }
 0x1c7   : > { %1278 = vmatprep.mubr.bf16.mxu1 %v1098_v60 }
 0x1cd   : > { %1053 = vmatmul.mubr.bf16.gmra.mrb[24].mxu0 %v872_v61 }
 0x1ce   : > { %1279 = vmatmul.mubr.bf16.gmra.mrb[24].mxu1 %v1097_v62  ;;  %1060 = vmatprep.mubr.bf16.mxu0 %v875_v63 }
 0x1cf   : > { %1286 = vmatprep.mubr.bf16.mxu1 %v1100_v0 }
 0x1d5   : > { %1061 = vmatmul.mubr.bf16.gmra.mrb[28].mxu0 %v874_v1 }
 0x1d6   : > { %1287 = vmatmul.mubr.bf16.gmra.mrb[28].mxu1 %v1099_v2  ;;  %1367 = vmatprep.mubr.bf16.mxu0 %v1621_v4 }
 0x270   : > { %v1006_v5 = vpop.f32.mrb[0].mxu0 }
 0x271   : > { %v1232_v6 = vpop.f32.mrb[0].mxu1  ;;  %v1008_v7 = vpop.f32.mrb[1].mxu0 }
 0x272   : > { %v1234_v8 = vpop.f32.mrb[1].mxu1  ;;  %v1009_v9 = vpop.f32.mrb[2].mxu0 }
 0x273   : > { %v1235_v10 = vpop.f32.mrb[2].mxu1  ;;  %v1069_v11 = vpack.c.bf16 %v1009_v9, %v1006_v5  ;;  %v1011_v13 = vpop.f32.mrb[3].mxu0 }
 0x274   : > { %v1295_v12 = vpack.c.bf16 %v1235_v10, %v1232_v6  ;;  %v1237_v14 = vpop.f32.mrb[3].mxu1 }
 0x276   : > { %1629 = vmatprep.subr.bf16.mxu0 %v1295_v12 }
 0x277   : > { %1630 = vmatpush3.bf16.msra.mxu0 %v1069_v11 }
 0x278   : > { %v1014_v15 = vpop.f32.mrb[4].mxu0 }
 0x279   : > { %v1240_v16 = vpop.f32.mrb[4].mxu1  ;;  %v1016_v17 = vpop.f32.mrb[5].mxu0 }
 0x27a   : > { %v1242_v18 = vpop.f32.mrb[5].mxu1  ;;  %v1017_v19 = vpop.f32.mrb[6].mxu0 }
 0x27b   : > { %v1243_v20 = vpop.f32.mrb[6].mxu1  ;;  %v1070_v21 = vpack.c.bf16 %v1017_v19, %v1014_v15  ;;  %v1019_v23 = vpop.f32.mrb[7].mxu0 }
 0x27c   : > { %v1296_v22 = vpack.c.bf16 %v1243_v20, %v1240_v16  ;;  %v1245_v24 = vpop.f32.mrb[7].mxu1 }
 0x27e   : > { %1631 = vmatprep.subr.bf16.mxu0 %v1296_v22  ;;  %v1620_v22 = vcombine.low %v2261_v3, %v2261_v3 }
 0x27f   : > { %1632 = vmatpush3.bf16.msra.mxu0 %v1070_v21 }
 0x280   : > { %v1022_v25 = vpop.f32.mrb[8].mxu0 }
 0x281   : > { %v1248_v26 = vpop.f32.mrb[8].mxu1  ;;  %v1024_v27 = vpop.f32.mrb[9].mxu0 }
 0x282   : > { %v1250_v28 = vpop.f32.mrb[9].mxu1  ;;  %v1025_v29 = vpop.f32.mrb[10].mxu0 }
 0x283   : > { %v1251_v30 = vpop.f32.mrb[10].mxu1  ;;  %v1071_v31 = vpack.c.bf16 %v1025_v29, %v1022_v25  ;;  %v1027_v33 = vpop.f32.mrb[11].mxu0  ;;  %v1376_v25 = vstv %s859_s8  ;;  %v1375_v29 = vld [vmem:[%s2061_s14] sm:$0xff]  ;;  %s1897_s14 = smov [#allocation8]  }
 0x284   : > { %v1297_v32 = vpack.c.bf16 %v1251_v30, %v1248_v26  ;;  %v1253_v34 = vpop.f32.mrb[11].mxu1  ;;  %s1794_s5 = sshll.u32 %s1897_s14, 4  ;;  %s1795_s5 = int_to_ptr.vmem [resolvable:$false] %s1794_s5 }
 0x285   : > { %s1796_s7 = scalar_lea.vmem %s1795_s5, 256  ;;  %p1797_p10 = scmp.lt.s32.totalorder %s2276_s2, %s1795_s5 }
 0x286   : > { %1633 = vmatprep.subr.bf16.mxu0 %v1297_v32  ;;  %p1798_p11 = scmp.lt.s32.totalorder %s1796_s7, %s1790_s27 }
 0x287   : > { %1634 = vmatpush3.bf16.msra.mxu0 %v1071_v31 }
 0x288   : > { %v1030_v35 = vpop.f32.mrb[12].mxu0  ;;  %p1799_p13 = por %p1798_p11, %p1797_p10 }
 0x289   : > { %v1256_v36 = vpop.f32.mrb[12].mxu1  ;;  %v1032_v37 = vpop.f32.mrb[13].mxu0 }
 0x28a   : > { %v1258_v38 = vpop.f32.mrb[13].mxu1  ;;  %v1033_v39 = vpop.f32.mrb[14].mxu0  ;;  %p1800_p0 = pnand %p1799_p13, %p1793_p8 }
 0x28b   : > { %v1259_v40 = vpop.f32.mrb[14].mxu1  ;;  %v1072_v41 = vpack.c.bf16 %v1033_v39, %v1030_v35  ;;  %v1035_v43 = vpop.f32.mrb[15].mxu0 }
 0x28c   : > { %v1298_v42 = vpack.c.bf16 %v1259_v40, %v1256_v36  ;;  %v1261_v44 = vpop.f32.mrb[15].mxu1 }
 0x28e   : > { %1635 = vmatprep.subr.bf16.mxu0 %v1298_v42 }
 0x28f   : > { %1636 = vmatpush3.bf16.msra.mxu0 %v1072_v41 }
 0x290   : > { %v1038_v45 = vpop.f32.mrb[16].mxu0 }
 0x291   : > { %v1264_v46 = vpop.f32.mrb[16].mxu1  ;;  %v1040_v47 = vpop.f32.mrb[17].mxu0 }
 0x292   : > { %v1266_v48 = vpop.f32.mrb[17].mxu1  ;;  %v1041_v49 = vpop.f32.mrb[18].mxu0 }
 0x293   : > { %v1267_v50 = vpop.f32.mrb[18].mxu1  ;;  %v1073_v51 = vpack.c.bf16 %v1041_v49, %v1038_v45  ;;  %v1043_v53 = vpop.f32.mrb[19].mxu0 }
 0x294   : > { %v1299_v52 = vpack.c.bf16 %v1267_v50, %v1264_v46  ;;  %v1269_v54 = vpop.f32.mrb[19].mxu1 }
 0x296   : > { %1637 = vmatprep.subr.bf16.mxu0 %v1299_v52 }
 0x297   : > { %1638 = vmatpush3.bf16.msra.mxu0 %v1073_v51 }
 0x298   : > { %v1046_v55 = vpop.f32.mrb[20].mxu0 }
 0x299   : > { %v1272_v56 = vpop.f32.mrb[20].mxu1  ;;  %v1048_v57 = vpop.f32.mrb[21].mxu0 }
 0x29a   : > { %v1274_v58 = vpop.f32.mrb[21].mxu1  ;;  %v1049_v59 = vpop.f32.mrb[22].mxu0 }
 0x29b   : > { %v1275_v60 = vpop.f32.mrb[22].mxu1  ;;  %v1074_v61 = vpack.c.bf16 %v1049_v59, %v1046_v55  ;;  %v1051_v63 = vpop.f32.mrb[23].mxu0 }
 0x29c   : > { %v1300_v62 = vpack.c.bf16 %v1275_v60, %v1272_v56  ;;  %v1277_v0 = vpop.f32.mrb[23].mxu1 }
 0x29e   : > { %1639 = vmatprep.subr.bf16.mxu0 %v1300_v62 }
 0x29f   : > { %1640 = vmatpush3.bf16.msra.mxu0 %v1074_v61 }
 0x2a0   : > { %v1054_v1 = vpop.f32.mrb[24].mxu0 }
 0x2a1   : > { %v1280_v2 = vpop.f32.mrb[24].mxu1  ;;  %v1056_v4 = vpop.f32.mrb[25].mxu0 }
 0x2a2   : > { %v1282_v5 = vpop.f32.mrb[25].mxu1  ;;  %v1057_v6 = vpop.f32.mrb[26].mxu0 }
 0x2a3   : > { %v1283_v7 = vpop.f32.mrb[26].mxu1  ;;  %v1075_v8 = vpack.c.bf16 %v1057_v6, %v1054_v1  ;;  %v1059_v10 = vpop.f32.mrb[27].mxu0 }
 0x2a4   : > { %v1301_v9 = vpack.c.bf16 %v1283_v7, %v1280_v2  ;;  %v1285_v11 = vpop.f32.mrb[27].mxu1 }
 0x2a6   : > { %1641 = vmatprep.subr.bf16.mxu0 %v1301_v9 }
 0x2a7   : > { %1642 = vmatpush3.bf16.msra.mxu0 %v1075_v8 }
 0x2a8   : > { %v1062_v12 = vpop.f32.mrb[28].mxu0 }
 0x2a9   : > { %v1288_v13 = vpop.f32.mrb[28].mxu1  ;;  %v1064_v14 = vpop.f32.mrb[29].mxu0 }
 0x2aa   : > { %v1290_v15 = vpop.f32.mrb[29].mxu1  ;;  %v1065_v16 = vpop.f32.mrb[30].mxu0 }
 0x2ab   : > { %v1291_v17 = vpop.f32.mrb[30].mxu1  ;;  %v1076_v18 = vpack.c.bf16 %v1065_v16, %v1062_v12  ;;  %v1067_v20 = vpop.f32.mrb[31].mxu0 }
 0x2ac   : > { %v1302_v19 = vpack.c.bf16 %v1291_v17, %v1288_v13  ;;  %v1293_v21 = vpop.f32.mrb[31].mxu1 }
 0x2ae   : > { %1643 = vmatprep.subr.bf16.mxu0 %v1302_v19 }
 0x2af   : > { %1644 = vmatpush3.bf16.msra.mxu0 %v1076_v18 }
 0x2b2   : > { %1368 = vmatmul.mubr.bf16.vlgmr.msra.gmra.mrb[32].mxu0 %v1620_v22 }
 0x385   : > { %v1645_v23 = vpop.f32.mrb[32].mxu0 }
 0x386   : > { %v1646_v24 = vpop.f32.mrb[33].mxu0 }
 0x387   : > { %v1647_v26 = vadd.f32 %v1646_v24, %v1645_v23  ;;  %v1648_v27 = vpop.f32.mrb[34].mxu0 }
 0x388   : > { %v1649_v28 = vpop.f32.mrb[35].mxu0 }
 0x389   : > { %v1377_v30 = vmul.f32 %v1647_v26, %v1376_v25 }
 0x38b   : > { %v1378_v31 = vadd.f32 %v1377_v30, %v1375_v29 }
 0x38d   : > { %1379 = vst [vmem:[%s2063_s9] sm:$0xff] %v1378_v31 }
 0x38e   : > { %1803 = shalt.err (!%p1800_p0)
}
 0x38f   : > { %s1804_s28 = scalar_lea.hbm %s2274_s22, 128  ;;  %s1808_s16 = scalar_lea.hbm %s2335_s6, 512 }
 0x390   : > { %p1805_p1 = scmp.ne.s32.totalorder %s2274_s22, %s1804_s28  ;;  %p1809_p4 = scmp.lt.u32.totalorder %s2274_s22, %s2335_s6 }
 0x391   : > { %p1810_p5 = scmp.lt.u32.totalorder %s1808_s16, %s1804_s28  ;;  %p1812_p7 = scmp.lt.u32.totalorder %s1804_s28, %s2274_s22 }
 0x392   : > { %p1806_p2 = pnand %p1805_p1, %p2000_p9 }
 0x393   : > { %p1811_p6 = por %p1810_p5, %p1809_p4 }
 0x394   : > { %p1807_p3 = pneg %p1806_p2 }
 0x395   : > { %p1813_p8 = por %p1812_p7, %p1811_p6 }
 0x397   : > { %p1814_p10 = pnand %p1813_p8, %p1807_p3 }
 0x399   : > { %1817 = shalt.err (!%p1814_p10)
}
 0x39a   : > { %1662 = dma.vmem_to_hbm [thread:$0]  (%p2000_p9), %s2276_s2, 128, %s2274_s22, %s1381_s26  }
 0x39b PF: > { %p1668_p11 = scmp.ge.s32.totalorder %s1888_s30, 2  ;;  %s1410_s8 = sand.u32 1, %s1860_s23  }
 0x39c   : > { %s1411_s11 = scalar_lea.sflag [#allocation7], %s1410_s8 }
 0x39d   : > { %p1665_p13 = pnand %p1668_p11, %p2007_p12 }
 0x39f   : > { %1855 = dma.done.wait (!%p1665_p13), %s1411_s11, 128  }
 0x3a0   : > { %1857 = vsyncadd (!%p1665_p13), %s1411_s11, 4294967168  ;;  %s23_s30 = sadd.s32 1, %s1888_s30   ;;  %s2350_s26 = sld [smem:[#allocation14_spill]] }
 0x3a1   : > { %p20_p0 = scmp.ge.s32.totalorder %s23_s30, 6   ;;  %s2351_s27 = sld [smem:[#allocation15_spill]] }
 0x3a2   : > { %s2352_s28 = sld [smem:[#allocation16_spill]]  ;;  %s2353_s29 = sld [smem:[#allocation17_spill]] }
 0x3a3   : > { %s2354_s23 = smov %s1864_s24  ;;  %s2355_s24 = smov %s1868_s25 }
 0x3a4   : > { %s2356_s25 = smov %s2012_s18  ;;  %22 = sbr.rel (!%p20_p0) target bundleno = 10 (0xa), region = 105 }
 0x3ab   :  { %1416 = vsyncpa [#allocation6], 1 }
 0x3ac   :  { %1418 = vsyncpa [#allocation6 + $0x1], 1 }
 0x3ad   :  { %1419 = vsyncpa [#allocation7], 1 }
 0x3ae   :  { %1421 = vsyncpa [#allocation7 + $0x1], 1 }

</bundles_post_ra>
